<compile_context>
chip_gen: v6e
topology: v6e:2x2x1
jax: 0.10.0
libtpu: 0.0.40
codegen_flags: <defaults>
</compile_context>

<pallas_src>
import math

import jax
import jax.numpy as jnp
import numpy as np
from jax.experimental import pallas as pl
from jax.experimental.pallas import tpu as pltpu


def _build_kernel(Bb, N, D, H, KD):
    """Kernel body for one grid step processing Bb batch elements."""
    R = Bb * N          # rows per step (batch-major, then node index)
    L = R * N           # flattened lane width: b*N*N + n*N + m
    TH = 2 * H          # compat channels: [pos heads 0..H-1, node heads 0..H-1]
    HK = H * KD         # fused per-branch Q (or K) width
    f32 = jnp.float32

    def kernel(h_ref, p_ref,
               w_nn_ref, w_gn_ref, w_np_ref, w_gp_ref,
               wqk_pos_ref, wqk_node_ref,
               w1_ref, b1_ref, w2_ref, b2_ref, w3_ref, b3_ref,
               out_ref):
        h3 = h_ref[...]                                   # (Bb, N, D)
        p3 = p_ref[...]
        h2 = h3.reshape(R, D)                             # safe leading-dim merge
        p2 = p3.reshape(R, D)

        # --- node/graph refinement: x @ W_node + broadcast(max(x) @ W_graph) ---
        # pooled branch runs on Bb rows only; no lane-axis concat, no (R, D)
        # broadcast materialized before the matmul.
        h_pool = jnp.dot(jnp.max(h3, axis=1), w_gn_ref[...],
                         preferred_element_type=f32)      # (Bb, D)
        p_pool = jnp.dot(jnp.max(p3, axis=1), w_gp_ref[...],
                         preferred_element_type=f32)
        h_node = (jnp.dot(h2, w_nn_ref[...], preferred_element_type=f32)
                  .reshape(Bb, N, D)
                  + jnp.broadcast_to(h_pool[:, None, :], (Bb, N, D))).reshape(R, D)
        h_pos = (jnp.dot(p2, w_np_ref[...], preferred_element_type=f32)
                 .reshape(Bb, N, D)
                 + jnp.broadcast_to(p_pool[:, None, :], (Bb, N, D))).reshape(R, D)

        # --- fused Q|K projection per branch: one (R, D) @ (D, 2*H*KD) matmul ---
        # (256 lanes fill the v6e/v7x MXU; 1/sqrt(KD) already folded into Wq.)
        qk_pos = jnp.dot(h_pos, wqk_pos_ref[...], preferred_element_type=f32)
        qk_node = jnp.dot(h_node, wqk_node_ref[...], preferred_element_type=f32)
        q_pos, k_pos = qk_pos[:, :HK], qk_pos[:, HK:]     # 128-aligned static slices
        q_node, k_node = qk_node[:, :HK], qk_node[:, HK:]

        # --- per-head compat, batched over the Bb batch elements ---
        def head_compat(q_all, k_all, head):
            s = slice(head * KD, (head + 1) * KD)
            qh = q_all[:, s].reshape(Bb, N, KD)           # safe leading-dim split
            kh = k_all[:, s].reshape(Bb, N, KD)
            c = jnp.einsum("bnk,bmk->bnm", qh, kh, preferred_element_type=f32)
            return c.reshape(R, N)                        # rows r = b*N + n

        channels = ([head_compat(q_pos, k_pos, h) for h in range(H)]
                    + [head_compat(q_node, k_node, h) for h in range(H)])

        # --- assemble comp (TH, L) lane-dense: comp[t, r*N + m] = channels[t][r, m]
        # Small static row slices + concatenates only; no selection matmul, no
        # iota masks, no Bb^2*N^3 intermediates.
        blocks = []
        for r in range(R):
            rows = [ch[r:r + 1, :] for ch in channels]    # TH x (1, N)
            blocks.append(jnp.concatenate(rows, axis=0))  # (TH, N)
        comp = jnp.concatenate(blocks, axis=1)            # (TH, L)

        # --- value-head MLP fused over all Bb*N*N positions (lane-dense matmuls)
        y1 = jnp.maximum(jnp.dot(w1_ref[...], comp, preferred_element_type=f32)
                         + b1_ref[...], 0.0)              # (F1, L)
        # TODO(synk): Dropout(p=0.05) after fc1 omitted (eval-mode identity).
        y2 = jnp.maximum(jnp.dot(w2_ref[...], y1, preferred_element_type=f32)
                         + b2_ref[...], 0.0)              # (F2, L)
        y3 = jnp.dot(w3_ref[...], y2, preferred_element_type=f32) + b3_ref[0]

        out_ref[0] = y3                                   # lane-dense (1, L) store

    return kernel


def multi_head_decoder_forward(h_em, pos_em, solving_state_for_net, params, n_heads,
                               batch_block=None):
    """Pallas implementation of MultiHeadDecoder.forward (solving_state unused)."""
    del solving_state_for_net  # unused by the reference forward as well
    B, N, D = h_em.shape
    H = n_heads
    KD = params["wq_pos"].shape[-1]
    F1 = params["w1"].shape[0]
    F2 = params["w2"].shape[0]
    TH = 2 * H
    norm = 1.0 / math.sqrt(KD)

    # --- wrapper-side (one-off) weight packing ---
    def pack_qk(wq, wk):
        # (H, D, KD) -> (D, H*KD) head-major along lanes; Q and K fused on lanes.
        q = (jnp.transpose(wq, (1, 0, 2)) * norm).reshape(D, H * KD)
        k = jnp.transpose(wk, (1, 0, 2)).reshape(D, H * KD)
        return jnp.concatenate([q, k], axis=1)            # (D, 2*H*KD)

    wqk_pos = pack_qk(params["wq_pos"], params["wk_pos"])
    wqk_node = pack_qk(params["wq_node"], params["wk_node"])

    # --- VMEM-aware batch-block choice; keep grid >= 2 so both v7x TCs get work.
    def vmem_bytes(bb):
        r = bb * N
        l = r * N
        data = 2 * 2 * bb * N * D                         # h, pos double-buffered
        out = 2 * l
        weights = 2 * (4 * D * D + 2 * D * TH * KD
                       + F1 * TH + F1 + F2 * F1 + F2 + F2)
        interm = 8 * r * max(D, TH * KD) + (TH + 2 * F1 + 2 * F2 + 2) * l
        return 4 * (data + out + weights + interm)

    budget = 20 * 2 ** 20
    if batch_block is None:
        cands = [bb for bb in range(1, min(B, 4) + 1)
                 if B % bb == 0 and vmem_bytes(bb) <= budget]
        if not cands:
            cands = [1]
        multi_core = [bb for bb in cands if B // bb >= 2]  # feed both v7x TCs
        batch_block = max(multi_core) if multi_core else max(cands)
    Bb = batch_block
    assert B % Bb == 0, "batch_block must divide the batch size"
    G = B // Bb
    L = Bb * N * N

    def full_spec(shape):
        nd = len(shape)
        return pl.BlockSpec(shape, lambda g, _nd=nd: (0,) * _nd)

    in_specs = [
        pl.BlockSpec((Bb, N, D), lambda g: (g, 0, 0)),    # h_em  (batch block)
        pl.BlockSpec((Bb, N, D), lambda g: (g, 0, 0)),    # pos_em
        full_spec((D, D)), full_spec((D, D)),             # W_node_node, W_graph_node
        full_spec((D, D)), full_spec((D, D)),             # W_node_pos,  W_graph_pos
        full_spec((D, 2 * H * KD)),                       # fused Wq|Wk (pos)
        full_spec((D, 2 * H * KD)),                       # fused Wq|Wk (node)
        full_spec((F1, TH)), full_spec((F1, 1)),          # fc1
        full_spec((F2, F1)), full_spec((F2, 1)),          # fc2
        full_spec((1, F2)),                               # fc3 weight
        pl.BlockSpec(memory_space=pltpu.MemorySpace.SMEM),  # fc3 bias (scalar)
    ]

    out = pl.pallas_call(
        _build_kernel(Bb, N, D, H, KD),
        out_shape=jax.ShapeDtypeStruct((G, 1, L), jnp.float32),
        grid=(G,),
        in_specs=in_specs,
        out_specs=pl.BlockSpec((1, 1, L), lambda g: (g, 0, 0)),
        compiler_params=pltpu.CompilerParams(
            dimension_semantics=("parallel",),
            vmem_limit_bytes=32 * 2 ** 20),
    )(h_em, pos_em,
      params["w_nn_t"], params["w_gn_t"], params["w_np_t"], params["w_gp_t"],
      wqk_pos, wqk_node,
      params["w1"], params["b1"].reshape(F1, 1),
      params["w2"], params["b2"].reshape(F2, 1),
      params["w3"], params["b3"].reshape(1,))

    return out.reshape(B, N, N)


def init_params(key, D, H, KD, F1=32, F2=32):
    """Deterministic synthetic parameters matching the torch module's shapes."""
    ks = jax.random.split(key, 14)

    def u(k, shape, stdv):
        return jax.random.uniform(k, shape, jnp.float32, minval=-stdv, maxval=stdv)

    sD = 1.0 / math.sqrt(D)
    sK = 1.0 / math.sqrt(KD)
    p = {}
    # nn.Linear(D, D, bias=False): torch weight is (out, in); we store its transpose.
    p["w_nn_t"] = u(ks[0], (D, D), sD).T
    p["w_gn_t"] = u(ks[1], (D, D), sD).T
    p["w_np_t"] = u(ks[2], (D, D), sD).T
    p["w_gp_t"] = u(ks[3], (D, D), sD).T
    # MultiHeadCompat W_query / W_key: (n_heads, input_dim, key_dim)
    p["wq_pos"] = u(ks[4], (H, D, KD), sK)
    p["wk_pos"] = u(ks[5], (H, D, KD), sK)
    p["wq_node"] = u(ks[6], (H, D, KD), sK)
    p["wk_node"] = u(ks[7], (H, D, KD), sK)
    # MLP(2H, 32, 32, 1) -- torch layout (out, in) / (out,)
    p["w1"] = u(ks[8], (F1, 2 * H), 1.0 / math.sqrt(2 * H))
    p["b1"] = u(ks[9], (F1,), 1.0 / math.sqrt(F1))
    p["w2"] = u(ks[10], (F2, F1), 1.0 / math.sqrt(F1))
    p["b2"] = u(ks[11], (F2,), 1.0 / math.sqrt(F2))
    p["w3"] = u(ks[12], (1, F2), 1.0 / math.sqrt(F2))
    p["b3"] = u(ks[13], (1,), 1.0)
    return p


def reference_forward(h_em, pos_em, params, n_heads):
    """Plain-JAX reference reproducing the PyTorch forward (eval mode)."""
    KD = params["wq_pos"].shape[-1]
    norm = 1.0 / math.sqrt(KD)

    def refine(x, w_node_t, w_graph_t):
        return x @ w_node_t + (jnp.max(x, axis=1) @ w_graph_t)[:, None, :]

    h_node = refine(h_em, params["w_nn_t"], params["w_gn_t"])
    h_pos = refine(pos_em, params["w_np_t"], params["w_gp_t"])

    def compat(x, wq, wk):
        Q = jnp.einsum("bnd,hdk->hbnk", x, wq)
        K = jnp.einsum("bnd,hdk->hbnk", x, wk)
        return norm * jnp.einsum("hbnk,hbmk->hbnm", Q, K)

    cp = jnp.transpose(compat(h_pos, params["wq_pos"], params["wk_pos"]), (1, 2, 3, 0))
    cn = jnp.transpose(compat(h_node, params["wq_node"], params["wk_node"]), (1, 2, 3, 0))
    comp = jnp.concatenate([cp, cn], axis=-1)                       # (B, N, N, 2H)

    y1 = jnp.maximum(comp @ params["w1"].T + params["b1"], 0.0)
    y2 = jnp.maximum(y1 @ params["w2"].T + params["b2"], 0.0)
    y3 = y2 @ params["w3"].T + params["b3"]
    return y3[..., 0]                                               # (B, N, N)


if __name__ == "__main__":
    B, N, D, H = 2, 16, 32, 4
    KD = D  # key_dim defaults to embed_dim when key_dim=None in the decoder

    key = jax.random.PRNGKey(0)
    k_h, k_p, k_s, k_params = jax.random.split(key, 4)
    h_em = jax.random.normal(k_h, (B, N, D), jnp.float32)
    pos_em = jax.random.normal(k_p, (B, N, D), jnp.float32)
    solving_state = jax.random.normal(k_s, (B, 4), jnp.float32)  # unused by forward
    params = init_params(k_params, D, H, KD)

    out = multi_head_decoder_forward(h_em, pos_em, solving_state, params, H)
    out = jax.block_until_ready(out)

    ref = reference_forward(h_em, pos_em, params, H)
    assert out.shape == (B, N, N)
    np.testing.assert_allclose(np.asarray(out), np.asarray(ref), rtol=1e-4, atol=1e-4)
    print("KERNEL_OK")
</pallas_src>

<mosaic_0001>
module attributes {stable_mosaic.version = 11 : i64} {
  func.func @kernel(%arg0: i32, %arg1: memref<1x16x32xf32, #tpu.memory_space<vmem>>, %arg2: memref<1x16x32xf32, #tpu.memory_space<vmem>>, %arg3: memref<32x32xf32, #tpu.memory_space<vmem>>, %arg4: memref<32x32xf32, #tpu.memory_space<vmem>>, %arg5: memref<32x32xf32, #tpu.memory_space<vmem>>, %arg6: memref<32x32xf32, #tpu.memory_space<vmem>>, %arg7: memref<32x256xf32, #tpu.memory_space<vmem>>, %arg8: memref<32x256xf32, #tpu.memory_space<vmem>>, %arg9: memref<32x8xf32, #tpu.memory_space<vmem>>, %arg10: memref<32x1xf32, #tpu.memory_space<vmem>>, %arg11: memref<32x32xf32, #tpu.memory_space<vmem>>, %arg12: memref<32x1xf32, #tpu.memory_space<vmem>>, %arg13: memref<1x32xf32, #tpu.memory_space<vmem>>, %arg14: memref<1xf32, #tpu.memory_space<smem>>, %arg15: memref<1x1x256xf32, #tpu.memory_space<vmem>>) attributes {dimension_semantics = [#tpu.dimension_semantics<parallel>], iteration_bounds = array<i64: 2>, scalar_prefetch = 0 : i64, scratch_operands = 0 : i64, tpu.core_type = #tpu.core_type<tc>, window_params = [{transform_indices = @transform_0, window_bounds = array<i64: 1, 16, 32>}, {transform_indices = @transform_1, window_bounds = array<i64: 1, 16, 32>}, {pipeline_mode = #tpu.pipeline_mode<synchronous>, transform_indices = @transform_2, window_bounds = array<i64: 32, 32>}, {pipeline_mode = #tpu.pipeline_mode<synchronous>, transform_indices = @transform_3, window_bounds = array<i64: 32, 32>}, {pipeline_mode = #tpu.pipeline_mode<synchronous>, transform_indices = @transform_4, window_bounds = array<i64: 32, 32>}, {pipeline_mode = #tpu.pipeline_mode<synchronous>, transform_indices = @transform_5, window_bounds = array<i64: 32, 32>}, {pipeline_mode = #tpu.pipeline_mode<synchronous>, transform_indices = @transform_6, window_bounds = array<i64: 32, 256>}, {pipeline_mode = #tpu.pipeline_mode<synchronous>, transform_indices = @transform_7, window_bounds = array<i64: 32, 256>}, {pipeline_mode = #tpu.pipeline_mode<synchronous>, transform_indices = @transform_8, window_bounds = array<i64: 32, 8>}, {pipeline_mode = #tpu.pipeline_mode<synchronous>, transform_indices = @transform_9, window_bounds = array<i64: 32, 1>}, {pipeline_mode = #tpu.pipeline_mode<synchronous>, transform_indices = @transform_10, window_bounds = array<i64: 32, 32>}, {pipeline_mode = #tpu.pipeline_mode<synchronous>, transform_indices = @transform_11, window_bounds = array<i64: 32, 1>}, {pipeline_mode = #tpu.pipeline_mode<synchronous>, transform_indices = @transform_12, window_bounds = array<i64: 1, 32>}, {transform_indices = @transform_13, window_bounds = array<i64: 1>}, {transform_indices = @transform_14, window_bounds = array<i64: 1, 1, 256>}]} {
    %c0 = arith.constant 0 : index
    %c0_0 = arith.constant 0 : index
    %c0_1 = arith.constant 0 : index
    %0 = vector.load %arg1[%c0, %c0_0, %c0_1] : memref<1x16x32xf32, #tpu.memory_space<vmem>>, vector<1x16x32xf32>
    %c0_2 = arith.constant 0 : index
    %c0_3 = arith.constant 0 : index
    %c0_4 = arith.constant 0 : index
    %1 = vector.load %arg2[%c0_2, %c0_3, %c0_4] : memref<1x16x32xf32, #tpu.memory_space<vmem>>, vector<1x16x32xf32>
    %2 = vector.shape_cast %0 : vector<1x16x32xf32> to vector<16x32xf32>
    %3 = vector.shape_cast %1 : vector<1x16x32xf32> to vector<16x32xf32>
    %cst = arith.constant dense<0xFF800000> : vector<1x32xf32>
    %4 = vector.multi_reduction <maximumf>, %0, %cst [1] : vector<1x16x32xf32> to vector<1x32xf32>
    %c0_5 = arith.constant 0 : index
    %c0_6 = arith.constant 0 : index
    %5 = vector.load %arg4[%c0_5, %c0_6] : memref<32x32xf32, #tpu.memory_space<vmem>>, vector<32x32xf32>
    %cst_7 = arith.constant dense<0.000000e+00> : vector<1x32xf32>
    %6 = tpu.matmul %4, %5, %cst_7 {dimension_numbers = #tpu.dot_dimension_numbers<[1], [0], [0], [1], [0, 0, 1, 1], [], []>} : vector<1x32xf32>, vector<32x32xf32>, vector<1x32xf32> -> vector<1x32xf32>
    %cst_8 = arith.constant dense<0xFF800000> : vector<1x32xf32>
    %7 = vector.multi_reduction <maximumf>, %1, %cst_8 [1] : vector<1x16x32xf32> to vector<1x32xf32>
    %c0_9 = arith.constant 0 : index
    %c0_10 = arith.constant 0 : index
    %8 = vector.load %arg6[%c0_9, %c0_10] : memref<32x32xf32, #tpu.memory_space<vmem>>, vector<32x32xf32>
    %cst_11 = arith.constant dense<0.000000e+00> : vector<1x32xf32>
    %9 = tpu.matmul %7, %8, %cst_11 {dimension_numbers = #tpu.dot_dimension_numbers<[1], [0], [0], [1], [0, 0, 1, 1], [], []>} : vector<1x32xf32>, vector<32x32xf32>, vector<1x32xf32> -> vector<1x32xf32>
    %c0_12 = arith.constant 0 : index
    %c0_13 = arith.constant 0 : index
    %10 = vector.load %arg3[%c0_12, %c0_13] : memref<32x32xf32, #tpu.memory_space<vmem>>, vector<32x32xf32>
    %cst_14 = arith.constant dense<0.000000e+00> : vector<16x32xf32>
    %11 = tpu.matmul %2, %10, %cst_14 {dimension_numbers = #tpu.dot_dimension_numbers<[1], [0], [0], [1], [0, 0, 1, 1], [], []>} : vector<16x32xf32>, vector<32x32xf32>, vector<16x32xf32> -> vector<16x32xf32>
    %12 = vector.shape_cast %11 : vector<16x32xf32> to vector<1x16x32xf32>
    %13 = vector.shape_cast %6 : vector<1x32xf32> to vector<1x1x32xf32>
    %14 = vector.shape_cast %13 : vector<1x1x32xf32> to vector<1x1x32xf32>
    %15 = vector.broadcast %14 : vector<1x1x32xf32> to vector<1x16x32xf32>
    %16 = arith.addf %12, %15 : vector<1x16x32xf32>
    %17 = vector.shape_cast %16 : vector<1x16x32xf32> to vector<16x32xf32>
    %c0_15 = arith.constant 0 : index
    %c0_16 = arith.constant 0 : index
    %18 = vector.load %arg5[%c0_15, %c0_16] : memref<32x32xf32, #tpu.memory_space<vmem>>, vector<32x32xf32>
    %cst_17 = arith.constant dense<0.000000e+00> : vector<16x32xf32>
    %19 = tpu.matmul %3, %18, %cst_17 {dimension_numbers = #tpu.dot_dimension_numbers<[1], [0], [0], [1], [0, 0, 1, 1], [], []>} : vector<16x32xf32>, vector<32x32xf32>, vector<16x32xf32> -> vector<16x32xf32>
    %20 = vector.shape_cast %19 : vector<16x32xf32> to vector<1x16x32xf32>
    %21 = vector.shape_cast %9 : vector<1x32xf32> to vector<1x1x32xf32>
    %22 = vector.shape_cast %21 : vector<1x1x32xf32> to vector<1x1x32xf32>
    %23 = vector.broadcast %22 : vector<1x1x32xf32> to vector<1x16x32xf32>
    %24 = arith.addf %20, %23 : vector<1x16x32xf32>
    %25 = vector.shape_cast %24 : vector<1x16x32xf32> to vector<16x32xf32>
    %c0_18 = arith.constant 0 : index
    %c0_19 = arith.constant 0 : index
    %26 = vector.load %arg7[%c0_18, %c0_19] : memref<32x256xf32, #tpu.memory_space<vmem>>, vector<32x256xf32>
    %cst_20 = arith.constant dense<0.000000e+00> : vector<16x256xf32>
    %27 = tpu.matmul %25, %26, %cst_20 {dimension_numbers = #tpu.dot_dimension_numbers<[1], [0], [0], [1], [0, 0, 1, 1], [], []>} : vector<16x32xf32>, vector<32x256xf32>, vector<16x256xf32> -> vector<16x256xf32>
    %c0_21 = arith.constant 0 : index
    %c0_22 = arith.constant 0 : index
    %28 = vector.load %arg8[%c0_21, %c0_22] : memref<32x256xf32, #tpu.memory_space<vmem>>, vector<32x256xf32>
    %cst_23 = arith.constant dense<0.000000e+00> : vector<16x256xf32>
    %29 = tpu.matmul %17, %28, %cst_23 {dimension_numbers = #tpu.dot_dimension_numbers<[1], [0], [0], [1], [0, 0, 1, 1], [], []>} : vector<16x32xf32>, vector<32x256xf32>, vector<16x256xf32> -> vector<16x256xf32>
    %30 = vector.extract_strided_slice %27 {offsets = [0, 0], sizes = [16, 128], strides = [1, 1]} : vector<16x256xf32> to vector<16x128xf32>
    %31 = vector.extract_strided_slice %27 {offsets = [0, 128], sizes = [16, 128], strides = [1, 1]} : vector<16x256xf32> to vector<16x128xf32>
    %32 = vector.extract_strided_slice %29 {offsets = [0, 0], sizes = [16, 128], strides = [1, 1]} : vector<16x256xf32> to vector<16x128xf32>
    %33 = vector.extract_strided_slice %29 {offsets = [0, 128], sizes = [16, 128], strides = [1, 1]} : vector<16x256xf32> to vector<16x128xf32>
    %34 = vector.extract_strided_slice %30 {offsets = [0, 0], sizes = [16, 32], strides = [1, 1]} : vector<16x128xf32> to vector<16x32xf32>
    %35 = vector.shape_cast %34 : vector<16x32xf32> to vector<1x16x32xf32>
    %36 = vector.extract_strided_slice %31 {offsets = [0, 0], sizes = [16, 32], strides = [1, 1]} : vector<16x128xf32> to vector<16x32xf32>
    %37 = vector.shape_cast %36 : vector<16x32xf32> to vector<1x16x32xf32>
    "tpu.trace_start"() <{level = 10 : i32, message = "bnk,bmk->bnm"}> : () -> ()
    %cst_24 = arith.constant dense<0.000000e+00> : vector<1x16x16xf32>
    %38 = tpu.matmul %35, %37, %cst_24 {dimension_numbers = #tpu.dot_dimension_numbers<[2], [2], [1], [1], [0, 0, 0, 1, 1, 1], [0], [0]>} : vector<1x16x32xf32>, vector<1x16x32xf32>, vector<1x16x16xf32> -> vector<1x16x16xf32>
    "tpu.trace_stop"() : () -> ()
    %39 = vector.shape_cast %38 : vector<1x16x16xf32> to vector<16x16xf32>
    %40 = vector.extract_strided_slice %30 {offsets = [0, 32], sizes = [16, 32], strides = [1, 1]} : vector<16x128xf32> to vector<16x32xf32>
    %41 = vector.shape_cast %40 : vector<16x32xf32> to vector<1x16x32xf32>
    %42 = vector.extract_strided_slice %31 {offsets = [0, 32], sizes = [16, 32], strides = [1, 1]} : vector<16x128xf32> to vector<16x32xf32>
    %43 = vector.shape_cast %42 : vector<16x32xf32> to vector<1x16x32xf32>
    "tpu.trace_start"() <{level = 10 : i32, message = "bnk,bmk->bnm"}> : () -> ()
    %cst_25 = arith.constant dense<0.000000e+00> : vector<1x16x16xf32>
    %44 = tpu.matmul %41, %43, %cst_25 {dimension_numbers = #tpu.dot_dimension_numbers<[2], [2], [1], [1], [0, 0, 0, 1, 1, 1], [0], [0]>} : vector<1x16x32xf32>, vector<1x16x32xf32>, vector<1x16x16xf32> -> vector<1x16x16xf32>
    "tpu.trace_stop"() : () -> ()
    %45 = vector.shape_cast %44 : vector<1x16x16xf32> to vector<16x16xf32>
    %46 = vector.extract_strided_slice %30 {offsets = [0, 64], sizes = [16, 32], strides = [1, 1]} : vector<16x128xf32> to vector<16x32xf32>
    %47 = vector.shape_cast %46 : vector<16x32xf32> to vector<1x16x32xf32>
    %48 = vector.extract_strided_slice %31 {offsets = [0, 64], sizes = [16, 32], strides = [1, 1]} : vector<16x128xf32> to vector<16x32xf32>
    %49 = vector.shape_cast %48 : vector<16x32xf32> to vector<1x16x32xf32>
    "tpu.trace_start"() <{level = 10 : i32, message = "bnk,bmk->bnm"}> : () -> ()
    %cst_26 = arith.constant dense<0.000000e+00> : vector<1x16x16xf32>
    %50 = tpu.matmul %47, %49, %cst_26 {dimension_numbers = #tpu.dot_dimension_numbers<[2], [2], [1], [1], [0, 0, 0, 1, 1, 1], [0], [0]>} : vector<1x16x32xf32>, vector<1x16x32xf32>, vector<1x16x16xf32> -> vector<1x16x16xf32>
    "tpu.trace_stop"() : () -> ()
    %51 = vector.shape_cast %50 : vector<1x16x16xf32> to vector<16x16xf32>
    %52 = vector.extract_strided_slice %30 {offsets = [0, 96], sizes = [16, 32], strides = [1, 1]} : vector<16x128xf32> to vector<16x32xf32>
    %53 = vector.shape_cast %52 : vector<16x32xf32> to vector<1x16x32xf32>
    %54 = vector.extract_strided_slice %31 {offsets = [0, 96], sizes = [16, 32], strides = [1, 1]} : vector<16x128xf32> to vector<16x32xf32>
    %55 = vector.shape_cast %54 : vector<16x32xf32> to vector<1x16x32xf32>
    "tpu.trace_start"() <{level = 10 : i32, message = "bnk,bmk->bnm"}> : () -> ()
    %cst_27 = arith.constant dense<0.000000e+00> : vector<1x16x16xf32>
    %56 = tpu.matmul %53, %55, %cst_27 {dimension_numbers = #tpu.dot_dimension_numbers<[2], [2], [1], [1], [0, 0, 0, 1, 1, 1], [0], [0]>} : vector<1x16x32xf32>, vector<1x16x32xf32>, vector<1x16x16xf32> -> vector<1x16x16xf32>
    "tpu.trace_stop"() : () -> ()
    %57 = vector.shape_cast %56 : vector<1x16x16xf32> to vector<16x16xf32>
    %58 = vector.extract_strided_slice %32 {offsets = [0, 0], sizes = [16, 32], strides = [1, 1]} : vector<16x128xf32> to vector<16x32xf32>
    %59 = vector.shape_cast %58 : vector<16x32xf32> to vector<1x16x32xf32>
    %60 = vector.extract_strided_slice %33 {offsets = [0, 0], sizes = [16, 32], strides = [1, 1]} : vector<16x128xf32> to vector<16x32xf32>
    %61 = vector.shape_cast %60 : vector<16x32xf32> to vector<1x16x32xf32>
    "tpu.trace_start"() <{level = 10 : i32, message = "bnk,bmk->bnm"}> : () -> ()
    %cst_28 = arith.constant dense<0.000000e+00> : vector<1x16x16xf32>
    %62 = tpu.matmul %59, %61, %cst_28 {dimension_numbers = #tpu.dot_dimension_numbers<[2], [2], [1], [1], [0, 0, 0, 1, 1, 1], [0], [0]>} : vector<1x16x32xf32>, vector<1x16x32xf32>, vector<1x16x16xf32> -> vector<1x16x16xf32>
    "tpu.trace_stop"() : () -> ()
    %63 = vector.shape_cast %62 : vector<1x16x16xf32> to vector<16x16xf32>
    %64 = vector.extract_strided_slice %32 {offsets = [0, 32], sizes = [16, 32], strides = [1, 1]} : vector<16x128xf32> to vector<16x32xf32>
    %65 = vector.shape_cast %64 : vector<16x32xf32> to vector<1x16x32xf32>
    %66 = vector.extract_strided_slice %33 {offsets = [0, 32], sizes = [16, 32], strides = [1, 1]} : vector<16x128xf32> to vector<16x32xf32>
    %67 = vector.shape_cast %66 : vector<16x32xf32> to vector<1x16x32xf32>
    "tpu.trace_start"() <{level = 10 : i32, message = "bnk,bmk->bnm"}> : () -> ()
    %cst_29 = arith.constant dense<0.000000e+00> : vector<1x16x16xf32>
    %68 = tpu.matmul %65, %67, %cst_29 {dimension_numbers = #tpu.dot_dimension_numbers<[2], [2], [1], [1], [0, 0, 0, 1, 1, 1], [0], [0]>} : vector<1x16x32xf32>, vector<1x16x32xf32>, vector<1x16x16xf32> -> vector<1x16x16xf32>
    "tpu.trace_stop"() : () -> ()
    %69 = vector.shape_cast %68 : vector<1x16x16xf32> to vector<16x16xf32>
    %70 = vector.extract_strided_slice %32 {offsets = [0, 64], sizes = [16, 32], strides = [1, 1]} : vector<16x128xf32> to vector<16x32xf32>
    %71 = vector.shape_cast %70 : vector<16x32xf32> to vector<1x16x32xf32>
    %72 = vector.extract_strided_slice %33 {offsets = [0, 64], sizes = [16, 32], strides = [1, 1]} : vector<16x128xf32> to vector<16x32xf32>
    %73 = vector.shape_cast %72 : vector<16x32xf32> to vector<1x16x32xf32>
    "tpu.trace_start"() <{level = 10 : i32, message = "bnk,bmk->bnm"}> : () -> ()
    %cst_30 = arith.constant dense<0.000000e+00> : vector<1x16x16xf32>
    %74 = tpu.matmul %71, %73, %cst_30 {dimension_numbers = #tpu.dot_dimension_numbers<[2], [2], [1], [1], [0, 0, 0, 1, 1, 1], [0], [0]>} : vector<1x16x32xf32>, vector<1x16x32xf32>, vector<1x16x16xf32> -> vector<1x16x16xf32>
    "tpu.trace_stop"() : () -> ()
    %75 = vector.shape_cast %74 : vector<1x16x16xf32> to vector<16x16xf32>
    %76 = vector.extract_strided_slice %32 {offsets = [0, 96], sizes = [16, 32], strides = [1, 1]} : vector<16x128xf32> to vector<16x32xf32>
    %77 = vector.shape_cast %76 : vector<16x32xf32> to vector<1x16x32xf32>
    %78 = vector.extract_strided_slice %33 {offsets = [0, 96], sizes = [16, 32], strides = [1, 1]} : vector<16x128xf32> to vector<16x32xf32>
    %79 = vector.shape_cast %78 : vector<16x32xf32> to vector<1x16x32xf32>
    "tpu.trace_start"() <{level = 10 : i32, message = "bnk,bmk->bnm"}> : () -> ()
    %cst_31 = arith.constant dense<0.000000e+00> : vector<1x16x16xf32>
    %80 = tpu.matmul %77, %79, %cst_31 {dimension_numbers = #tpu.dot_dimension_numbers<[2], [2], [1], [1], [0, 0, 0, 1, 1, 1], [0], [0]>} : vector<1x16x32xf32>, vector<1x16x32xf32>, vector<1x16x16xf32> -> vector<1x16x16xf32>
    "tpu.trace_stop"() : () -> ()
    %81 = vector.shape_cast %80 : vector<1x16x16xf32> to vector<16x16xf32>
    %82 = vector.extract_strided_slice %39 {offsets = [0, 0], sizes = [1, 16], strides = [1, 1]} : vector<16x16xf32> to vector<1x16xf32>
    %83 = vector.extract_strided_slice %45 {offsets = [0, 0], sizes = [1, 16], strides = [1, 1]} : vector<16x16xf32> to vector<1x16xf32>
    %84 = vector.extract_strided_slice %51 {offsets = [0, 0], sizes = [1, 16], strides = [1, 1]} : vector<16x16xf32> to vector<1x16xf32>
    %85 = vector.extract_strided_slice %57 {offsets = [0, 0], sizes = [1, 16], strides = [1, 1]} : vector<16x16xf32> to vector<1x16xf32>
    %86 = vector.extract_strided_slice %63 {offsets = [0, 0], sizes = [1, 16], strides = [1, 1]} : vector<16x16xf32> to vector<1x16xf32>
    %87 = vector.extract_strided_slice %69 {offsets = [0, 0], sizes = [1, 16], strides = [1, 1]} : vector<16x16xf32> to vector<1x16xf32>
    %88 = vector.extract_strided_slice %75 {offsets = [0, 0], sizes = [1, 16], strides = [1, 1]} : vector<16x16xf32> to vector<1x16xf32>
    %89 = vector.extract_strided_slice %81 {offsets = [0, 0], sizes = [1, 16], strides = [1, 1]} : vector<16x16xf32> to vector<1x16xf32>
    %90 = tpu.concatenate %82, %83, %84, %85, %86, %87, %88, %89 in 0 : vector<1x16xf32>, vector<1x16xf32>, vector<1x16xf32>, vector<1x16xf32>, vector<1x16xf32>, vector<1x16xf32>, vector<1x16xf32>, vector<1x16xf32> -> vector<8x16xf32>
    %91 = vector.extract_strided_slice %39 {offsets = [1, 0], sizes = [1, 16], strides = [1, 1]} : vector<16x16xf32> to vector<1x16xf32>
    %92 = vector.extract_strided_slice %45 {offsets = [1, 0], sizes = [1, 16], strides = [1, 1]} : vector<16x16xf32> to vector<1x16xf32>
    %93 = vector.extract_strided_slice %51 {offsets = [1, 0], sizes = [1, 16], strides = [1, 1]} : vector<16x16xf32> to vector<1x16xf32>
    %94 = vector.extract_strided_slice %57 {offsets = [1, 0], sizes = [1, 16], strides = [1, 1]} : vector<16x16xf32> to vector<1x16xf32>
    %95 = vector.extract_strided_slice %63 {offsets = [1, 0], sizes = [1, 16], strides = [1, 1]} : vector<16x16xf32> to vector<1x16xf32>
    %96 = vector.extract_strided_slice %69 {offsets = [1, 0], sizes = [1, 16], strides = [1, 1]} : vector<16x16xf32> to vector<1x16xf32>
    %97 = vector.extract_strided_slice %75 {offsets = [1, 0], sizes = [1, 16], strides = [1, 1]} : vector<16x16xf32> to vector<1x16xf32>
    %98 = vector.extract_strided_slice %81 {offsets = [1, 0], sizes = [1, 16], strides = [1, 1]} : vector<16x16xf32> to vector<1x16xf32>
    %99 = tpu.concatenate %91, %92, %93, %94, %95, %96, %97, %98 in 0 : vector<1x16xf32>, vector<1x16xf32>, vector<1x16xf32>, vector<1x16xf32>, vector<1x16xf32>, vector<1x16xf32>, vector<1x16xf32>, vector<1x16xf32> -> vector<8x16xf32>
    %100 = vector.extract_strided_slice %39 {offsets = [2, 0], sizes = [1, 16], strides = [1, 1]} : vector<16x16xf32> to vector<1x16xf32>
    %101 = vector.extract_strided_slice %45 {offsets = [2, 0], sizes = [1, 16], strides = [1, 1]} : vector<16x16xf32> to vector<1x16xf32>
    %102 = vector.extract_strided_slice %51 {offsets = [2, 0], sizes = [1, 16], strides = [1, 1]} : vector<16x16xf32> to vector<1x16xf32>
    %103 = vector.extract_strided_slice %57 {offsets = [2, 0], sizes = [1, 16], strides = [1, 1]} : vector<16x16xf32> to vector<1x16xf32>
    %104 = vector.extract_strided_slice %63 {offsets = [2, 0], sizes = [1, 16], strides = [1, 1]} : vector<16x16xf32> to vector<1x16xf32>
    %105 = vector.extract_strided_slice %69 {offsets = [2, 0], sizes = [1, 16], strides = [1, 1]} : vector<16x16xf32> to vector<1x16xf32>
    %106 = vector.extract_strided_slice %75 {offsets = [2, 0], sizes = [1, 16], strides = [1, 1]} : vector<16x16xf32> to vector<1x16xf32>
    %107 = vector.extract_strided_slice %81 {offsets = [2, 0], sizes = [1, 16], strides = [1, 1]} : vector<16x16xf32> to vector<1x16xf32>
    %108 = tpu.concatenate %100, %101, %102, %103, %104, %105, %106, %107 in 0 : vector<1x16xf32>, vector<1x16xf32>, vector<1x16xf32>, vector<1x16xf32>, vector<1x16xf32>, vector<1x16xf32>, vector<1x16xf32>, vector<1x16xf32> -> vector<8x16xf32>
    %109 = vector.extract_strided_slice %39 {offsets = [3, 0], sizes = [1, 16], strides = [1, 1]} : vector<16x16xf32> to vector<1x16xf32>
    %110 = vector.extract_strided_slice %45 {offsets = [3, 0], sizes = [1, 16], strides = [1, 1]} : vector<16x16xf32> to vector<1x16xf32>
    %111 = vector.extract_strided_slice %51 {offsets = [3, 0], sizes = [1, 16], strides = [1, 1]} : vector<16x16xf32> to vector<1x16xf32>
    %112 = vector.extract_strided_slice %57 {offsets = [3, 0], sizes = [1, 16], strides = [1, 1]} : vector<16x16xf32> to vector<1x16xf32>
    %113 = vector.extract_strided_slice %63 {offsets = [3, 0], sizes = [1, 16], strides = [1, 1]} : vector<16x16xf32> to vector<1x16xf32>
    %114 = vector.extract_strided_slice %69 {offsets = [3, 0], sizes = [1, 16], strides = [1, 1]} : vector<16x16xf32> to vector<1x16xf32>
    %115 = vector.extract_strided_slice %75 {offsets = [3, 0], sizes = [1, 16], strides = [1, 1]} : vector<16x16xf32> to vector<1x16xf32>
    %116 = vector.extract_strided_slice %81 {offsets = [3, 0], sizes = [1, 16], strides = [1, 1]} : vector<16x16xf32> to vector<1x16xf32>
    %117 = tpu.concatenate %109, %110, %111, %112, %113, %114, %115, %116 in 0 : vector<1x16xf32>, vector<1x16xf32>, vector<1x16xf32>, vector<1x16xf32>, vector<1x16xf32>, vector<1x16xf32>, vector<1x16xf32>, vector<1x16xf32> -> vector<8x16xf32>
    %118 = vector.extract_strided_slice %39 {offsets = [4, 0], sizes = [1, 16], strides = [1, 1]} : vector<16x16xf32> to vector<1x16xf32>
    %119 = vector.extract_strided_slice %45 {offsets = [4, 0], sizes = [1, 16], strides = [1, 1]} : vector<16x16xf32> to vector<1x16xf32>
    %120 = vector.extract_strided_slice %51 {offsets = [4, 0], sizes = [1, 16], strides = [1, 1]} : vector<16x16xf32> to vector<1x16xf32>
    %121 = vector.extract_strided_slice %57 {offsets = [4, 0], sizes = [1, 16], strides = [1, 1]} : vector<16x16xf32> to vector<1x16xf32>
    %122 = vector.extract_strided_slice %63 {offsets = [4, 0], sizes = [1, 16], strides = [1, 1]} : vector<16x16xf32> to vector<1x16xf32>
    %123 = vector.extract_strided_slice %69 {offsets = [4, 0], sizes = [1, 16], strides = [1, 1]} : vector<16x16xf32> to vector<1x16xf32>
    %124 = vector.extract_strided_slice %75 {offsets = [4, 0], sizes = [1, 16], strides = [1, 1]} : vector<16x16xf32> to vector<1x16xf32>
    %125 = vector.extract_strided_slice %81 {offsets = [4, 0], sizes = [1, 16], strides = [1, 1]} : vector<16x16xf32> to vector<1x16xf32>
    %126 = tpu.concatenate %118, %119, %120, %121, %122, %123, %124, %125 in 0 : vector<1x16xf32>, vector<1x16xf32>, vector<1x16xf32>, vector<1x16xf32>, vector<1x16xf32>, vector<1x16xf32>, vector<1x16xf32>, vector<1x16xf32> -> vector<8x16xf32>
    %127 = vector.extract_strided_slice %39 {offsets = [5, 0], sizes = [1, 16], strides = [1, 1]} : vector<16x16xf32> to vector<1x16xf32>
    %128 = vector.extract_strided_slice %45 {offsets = [5, 0], sizes = [1, 16], strides = [1, 1]} : vector<16x16xf32> to vector<1x16xf32>
    %129 = vector.extract_strided_slice %51 {offsets = [5, 0], sizes = [1, 16], strides = [1, 1]} : vector<16x16xf32> to vector<1x16xf32>
    %130 = vector.extract_strided_slice %57 {offsets = [5, 0], sizes = [1, 16], strides = [1, 1]} : vector<16x16xf32> to vector<1x16xf32>
    %131 = vector.extract_strided_slice %63 {offsets = [5, 0], sizes = [1, 16], strides = [1, 1]} : vector<16x16xf32> to vector<1x16xf32>
    %132 = vector.extract_strided_slice %69 {offsets = [5, 0], sizes = [1, 16], strides = [1, 1]} : vector<16x16xf32> to vector<1x16xf32>
    %133 = vector.extract_strided_slice %75 {offsets = [5, 0], sizes = [1, 16], strides = [1, 1]} : vector<16x16xf32> to vector<1x16xf32>
    %134 = vector.extract_strided_slice %81 {offsets = [5, 0], sizes = [1, 16], strides = [1, 1]} : vector<16x16xf32> to vector<1x16xf32>
    %135 = tpu.concatenate %127, %128, %129, %130, %131, %132, %133, %134 in 0 : vector<1x16xf32>, vector<1x16xf32>, vector<1x16xf32>, vector<1x16xf32>, vector<1x16xf32>, vector<1x16xf32>, vector<1x16xf32>, vector<1x16xf32> -> vector<8x16xf32>
    %136 = vector.extract_strided_slice %39 {offsets = [6, 0], sizes = [1, 16], strides = [1, 1]} : vector<16x16xf32> to vector<1x16xf32>
    %137 = vector.extract_strided_slice %45 {offsets = [6, 0], sizes = [1, 16], strides = [1, 1]} : vector<16x16xf32> to vector<1x16xf32>
    %138 = vector.extract_strided_slice %51 {offsets = [6, 0], sizes = [1, 16], strides = [1, 1]} : vector<16x16xf32> to vector<1x16xf32>
    %139 = vector.extract_strided_slice %57 {offsets = [6, 0], sizes = [1, 16], strides = [1, 1]} : vector<16x16xf32> to vector<1x16xf32>
    %140 = vector.extract_strided_slice %63 {offsets = [6, 0], sizes = [1, 16], strides = [1, 1]} : vector<16x16xf32> to vector<1x16xf32>
    %141 = vector.extract_strided_slice %69 {offsets = [6, 0], sizes = [1, 16], strides = [1, 1]} : vector<16x16xf32> to vector<1x16xf32>
    %142 = vector.extract_strided_slice %75 {offsets = [6, 0], sizes = [1, 16], strides = [1, 1]} : vector<16x16xf32> to vector<1x16xf32>
    %143 = vector.extract_strided_slice %81 {offsets = [6, 0], sizes = [1, 16], strides = [1, 1]} : vector<16x16xf32> to vector<1x16xf32>
    %144 = tpu.concatenate %136, %137, %138, %139, %140, %141, %142, %143 in 0 : vector<1x16xf32>, vector<1x16xf32>, vector<1x16xf32>, vector<1x16xf32>, vector<1x16xf32>, vector<1x16xf32>, vector<1x16xf32>, vector<1x16xf32> -> vector<8x16xf32>
    %145 = vector.extract_strided_slice %39 {offsets = [7, 0], sizes = [1, 16], strides = [1, 1]} : vector<16x16xf32> to vector<1x16xf32>
    %146 = vector.extract_strided_slice %45 {offsets = [7, 0], sizes = [1, 16], strides = [1, 1]} : vector<16x16xf32> to vector<1x16xf32>
    %147 = vector.extract_strided_slice %51 {offsets = [7, 0], sizes = [1, 16], strides = [1, 1]} : vector<16x16xf32> to vector<1x16xf32>
    %148 = vector.extract_strided_slice %57 {offsets = [7, 0], sizes = [1, 16], strides = [1, 1]} : vector<16x16xf32> to vector<1x16xf32>
    %149 = vector.extract_strided_slice %63 {offsets = [7, 0], sizes = [1, 16], strides = [1, 1]} : vector<16x16xf32> to vector<1x16xf32>
    %150 = vector.extract_strided_slice %69 {offsets = [7, 0], sizes = [1, 16], strides = [1, 1]} : vector<16x16xf32> to vector<1x16xf32>
    %151 = vector.extract_strided_slice %75 {offsets = [7, 0], sizes = [1, 16], strides = [1, 1]} : vector<16x16xf32> to vector<1x16xf32>
    %152 = vector.extract_strided_slice %81 {offsets = [7, 0], sizes = [1, 16], strides = [1, 1]} : vector<16x16xf32> to vector<1x16xf32>
    %153 = tpu.concatenate %145, %146, %147, %148, %149, %150, %151, %152 in 0 : vector<1x16xf32>, vector<1x16xf32>, vector<1x16xf32>, vector<1x16xf32>, vector<1x16xf32>, vector<1x16xf32>, vector<1x16xf32>, vector<1x16xf32> -> vector<8x16xf32>
    %154 = vector.extract_strided_slice %39 {offsets = [8, 0], sizes = [1, 16], strides = [1, 1]} : vector<16x16xf32> to vector<1x16xf32>
    %155 = vector.extract_strided_slice %45 {offsets = [8, 0], sizes = [1, 16], strides = [1, 1]} : vector<16x16xf32> to vector<1x16xf32>
    %156 = vector.extract_strided_slice %51 {offsets = [8, 0], sizes = [1, 16], strides = [1, 1]} : vector<16x16xf32> to vector<1x16xf32>
    %157 = vector.extract_strided_slice %57 {offsets = [8, 0], sizes = [1, 16], strides = [1, 1]} : vector<16x16xf32> to vector<1x16xf32>
    %158 = vector.extract_strided_slice %63 {offsets = [8, 0], sizes = [1, 16], strides = [1, 1]} : vector<16x16xf32> to vector<1x16xf32>
    %159 = vector.extract_strided_slice %69 {offsets = [8, 0], sizes = [1, 16], strides = [1, 1]} : vector<16x16xf32> to vector<1x16xf32>
    %160 = vector.extract_strided_slice %75 {offsets = [8, 0], sizes = [1, 16], strides = [1, 1]} : vector<16x16xf32> to vector<1x16xf32>
    %161 = vector.extract_strided_slice %81 {offsets = [8, 0], sizes = [1, 16], strides = [1, 1]} : vector<16x16xf32> to vector<1x16xf32>
    %162 = tpu.concatenate %154, %155, %156, %157, %158, %159, %160, %161 in 0 : vector<1x16xf32>, vector<1x16xf32>, vector<1x16xf32>, vector<1x16xf32>, vector<1x16xf32>, vector<1x16xf32>, vector<1x16xf32>, vector<1x16xf32> -> vector<8x16xf32>
    %163 = vector.extract_strided_slice %39 {offsets = [9, 0], sizes = [1, 16], strides = [1, 1]} : vector<16x16xf32> to vector<1x16xf32>
    %164 = vector.extract_strided_slice %45 {offsets = [9, 0], sizes = [1, 16], strides = [1, 1]} : vector<16x16xf32> to vector<1x16xf32>
    %165 = vector.extract_strided_slice %51 {offsets = [9, 0], sizes = [1, 16], strides = [1, 1]} : vector<16x16xf32> to vector<1x16xf32>
    %166 = vector.extract_strided_slice %57 {offsets = [9, 0], sizes = [1, 16], strides = [1, 1]} : vector<16x16xf32> to vector<1x16xf32>
    %167 = vector.extract_strided_slice %63 {offsets = [9, 0], sizes = [1, 16], strides = [1, 1]} : vector<16x16xf32> to vector<1x16xf32>
    %168 = vector.extract_strided_slice %69 {offsets = [9, 0], sizes = [1, 16], strides = [1, 1]} : vector<16x16xf32> to vector<1x16xf32>
    %169 = vector.extract_strided_slice %75 {offsets = [9, 0], sizes = [1, 16], strides = [1, 1]} : vector<16x16xf32> to vector<1x16xf32>
    %170 = vector.extract_strided_slice %81 {offsets = [9, 0], sizes = [1, 16], strides = [1, 1]} : vector<16x16xf32> to vector<1x16xf32>
    %171 = tpu.concatenate %163, %164, %165, %166, %167, %168, %169, %170 in 0 : vector<1x16xf32>, vector<1x16xf32>, vector<1x16xf32>, vector<1x16xf32>, vector<1x16xf32>, vector<1x16xf32>, vector<1x16xf32>, vector<1x16xf32> -> vector<8x16xf32>
    %172 = vector.extract_strided_slice %39 {offsets = [10, 0], sizes = [1, 16], strides = [1, 1]} : vector<16x16xf32> to vector<1x16xf32>
    %173 = vector.extract_strided_slice %45 {offsets = [10, 0], sizes = [1, 16], strides = [1, 1]} : vector<16x16xf32> to vector<1x16xf32>
    %174 = vector.extract_strided_slice %51 {offsets = [10, 0], sizes = [1, 16], strides = [1, 1]} : vector<16x16xf32> to vector<1x16xf32>
    %175 = vector.extract_strided_slice %57 {offsets = [10, 0], sizes = [1, 16], strides = [1, 1]} : vector<16x16xf32> to vector<1x16xf32>
    %176 = vector.extract_strided_slice %63 {offsets = [10, 0], sizes = [1, 16], strides = [1, 1]} : vector<16x16xf32> to vector<1x16xf32>
    %177 = vector.extract_strided_slice %69 {offsets = [10, 0], sizes = [1, 16], strides = [1, 1]} : vector<16x16xf32> to vector<1x16xf32>
    %178 = vector.extract_strided_slice %75 {offsets = [10, 0], sizes = [1, 16], strides = [1, 1]} : vector<16x16xf32> to vector<1x16xf32>
    %179 = vector.extract_strided_slice %81 {offsets = [10, 0], sizes = [1, 16], strides = [1, 1]} : vector<16x16xf32> to vector<1x16xf32>
    %180 = tpu.concatenate %172, %173, %174, %175, %176, %177, %178, %179 in 0 : vector<1x16xf32>, vector<1x16xf32>, vector<1x16xf32>, vector<1x16xf32>, vector<1x16xf32>, vector<1x16xf32>, vector<1x16xf32>, vector<1x16xf32> -> vector<8x16xf32>
    %181 = vector.extract_strided_slice %39 {offsets = [11, 0], sizes = [1, 16], strides = [1, 1]} : vector<16x16xf32> to vector<1x16xf32>
    %182 = vector.extract_strided_slice %45 {offsets = [11, 0], sizes = [1, 16], strides = [1, 1]} : vector<16x16xf32> to vector<1x16xf32>
    %183 = vector.extract_strided_slice %51 {offsets = [11, 0], sizes = [1, 16], strides = [1, 1]} : vector<16x16xf32> to vector<1x16xf32>
    %184 = vector.extract_strided_slice %57 {offsets = [11, 0], sizes = [1, 16], strides = [1, 1]} : vector<16x16xf32> to vector<1x16xf32>
    %185 = vector.extract_strided_slice %63 {offsets = [11, 0], sizes = [1, 16], strides = [1, 1]} : vector<16x16xf32> to vector<1x16xf32>
    %186 = vector.extract_strided_slice %69 {offsets = [11, 0], sizes = [1, 16], strides = [1, 1]} : vector<16x16xf32> to vector<1x16xf32>
    %187 = vector.extract_strided_slice %75 {offsets = [11, 0], sizes = [1, 16], strides = [1, 1]} : vector<16x16xf32> to vector<1x16xf32>
    %188 = vector.extract_strided_slice %81 {offsets = [11, 0], sizes = [1, 16], strides = [1, 1]} : vector<16x16xf32> to vector<1x16xf32>
    %189 = tpu.concatenate %181, %182, %183, %184, %185, %186, %187, %188 in 0 : vector<1x16xf32>, vector<1x16xf32>, vector<1x16xf32>, vector<1x16xf32>, vector<1x16xf32>, vector<1x16xf32>, vector<1x16xf32>, vector<1x16xf32> -> vector<8x16xf32>
    %190 = vector.extract_strided_slice %39 {offsets = [12, 0], sizes = [1, 16], strides = [1, 1]} : vector<16x16xf32> to vector<1x16xf32>
    %191 = vector.extract_strided_slice %45 {offsets = [12, 0], sizes = [1, 16], strides = [1, 1]} : vector<16x16xf32> to vector<1x16xf32>
    %192 = vector.extract_strided_slice %51 {offsets = [12, 0], sizes = [1, 16], strides = [1, 1]} : vector<16x16xf32> to vector<1x16xf32>
    %193 = vector.extract_strided_slice %57 {offsets = [12, 0], sizes = [1, 16], strides = [1, 1]} : vector<16x16xf32> to vector<1x16xf32>
    %194 = vector.extract_strided_slice %63 {offsets = [12, 0], sizes = [1, 16], strides = [1, 1]} : vector<16x16xf32> to vector<1x16xf32>
    %195 = vector.extract_strided_slice %69 {offsets = [12, 0], sizes = [1, 16], strides = [1, 1]} : vector<16x16xf32> to vector<1x16xf32>
    %196 = vector.extract_strided_slice %75 {offsets = [12, 0], sizes = [1, 16], strides = [1, 1]} : vector<16x16xf32> to vector<1x16xf32>
    %197 = vector.extract_strided_slice %81 {offsets = [12, 0], sizes = [1, 16], strides = [1, 1]} : vector<16x16xf32> to vector<1x16xf32>
    %198 = tpu.concatenate %190, %191, %192, %193, %194, %195, %196, %197 in 0 : vector<1x16xf32>, vector<1x16xf32>, vector<1x16xf32>, vector<1x16xf32>, vector<1x16xf32>, vector<1x16xf32>, vector<1x16xf32>, vector<1x16xf32> -> vector<8x16xf32>
    %199 = vector.extract_strided_slice %39 {offsets = [13, 0], sizes = [1, 16], strides = [1, 1]} : vector<16x16xf32> to vector<1x16xf32>
    %200 = vector.extract_strided_slice %45 {offsets = [13, 0], sizes = [1, 16], strides = [1, 1]} : vector<16x16xf32> to vector<1x16xf32>
    %201 = vector.extract_strided_slice %51 {offsets = [13, 0], sizes = [1, 16], strides = [1, 1]} : vector<16x16xf32> to vector<1x16xf32>
    %202 = vector.extract_strided_slice %57 {offsets = [13, 0], sizes = [1, 16], strides = [1, 1]} : vector<16x16xf32> to vector<1x16xf32>
    %203 = vector.extract_strided_slice %63 {offsets = [13, 0], sizes = [1, 16], strides = [1, 1]} : vector<16x16xf32> to vector<1x16xf32>
    %204 = vector.extract_strided_slice %69 {offsets = [13, 0], sizes = [1, 16], strides = [1, 1]} : vector<16x16xf32> to vector<1x16xf32>
    %205 = vector.extract_strided_slice %75 {offsets = [13, 0], sizes = [1, 16], strides = [1, 1]} : vector<16x16xf32> to vector<1x16xf32>
    %206 = vector.extract_strided_slice %81 {offsets = [13, 0], sizes = [1, 16], strides = [1, 1]} : vector<16x16xf32> to vector<1x16xf32>
    %207 = tpu.concatenate %199, %200, %201, %202, %203, %204, %205, %206 in 0 : vector<1x16xf32>, vector<1x16xf32>, vector<1x16xf32>, vector<1x16xf32>, vector<1x16xf32>, vector<1x16xf32>, vector<1x16xf32>, vector<1x16xf32> -> vector<8x16xf32>
    %208 = vector.extract_strided_slice %39 {offsets = [14, 0], sizes = [1, 16], strides = [1, 1]} : vector<16x16xf32> to vector<1x16xf32>
    %209 = vector.extract_strided_slice %45 {offsets = [14, 0], sizes = [1, 16], strides = [1, 1]} : vector<16x16xf32> to vector<1x16xf32>
    %210 = vector.extract_strided_slice %51 {offsets = [14, 0], sizes = [1, 16], strides = [1, 1]} : vector<16x16xf32> to vector<1x16xf32>
    %211 = vector.extract_strided_slice %57 {offsets = [14, 0], sizes = [1, 16], strides = [1, 1]} : vector<16x16xf32> to vector<1x16xf32>
    %212 = vector.extract_strided_slice %63 {offsets = [14, 0], sizes = [1, 16], strides = [1, 1]} : vector<16x16xf32> to vector<1x16xf32>
    %213 = vector.extract_strided_slice %69 {offsets = [14, 0], sizes = [1, 16], strides = [1, 1]} : vector<16x16xf32> to vector<1x16xf32>
    %214 = vector.extract_strided_slice %75 {offsets = [14, 0], sizes = [1, 16], strides = [1, 1]} : vector<16x16xf32> to vector<1x16xf32>
    %215 = vector.extract_strided_slice %81 {offsets = [14, 0], sizes = [1, 16], strides = [1, 1]} : vector<16x16xf32> to vector<1x16xf32>
    %216 = tpu.concatenate %208, %209, %210, %211, %212, %213, %214, %215 in 0 : vector<1x16xf32>, vector<1x16xf32>, vector<1x16xf32>, vector<1x16xf32>, vector<1x16xf32>, vector<1x16xf32>, vector<1x16xf32>, vector<1x16xf32> -> vector<8x16xf32>
    %217 = vector.extract_strided_slice %39 {offsets = [15, 0], sizes = [1, 16], strides = [1, 1]} : vector<16x16xf32> to vector<1x16xf32>
    %218 = vector.extract_strided_slice %45 {offsets = [15, 0], sizes = [1, 16], strides = [1, 1]} : vector<16x16xf32> to vector<1x16xf32>
    %219 = vector.extract_strided_slice %51 {offsets = [15, 0], sizes = [1, 16], strides = [1, 1]} : vector<16x16xf32> to vector<1x16xf32>
    %220 = vector.extract_strided_slice %57 {offsets = [15, 0], sizes = [1, 16], strides = [1, 1]} : vector<16x16xf32> to vector<1x16xf32>
    %221 = vector.extract_strided_slice %63 {offsets = [15, 0], sizes = [1, 16], strides = [1, 1]} : vector<16x16xf32> to vector<1x16xf32>
    %222 = vector.extract_strided_slice %69 {offsets = [15, 0], sizes = [1, 16], strides = [1, 1]} : vector<16x16xf32> to vector<1x16xf32>
    %223 = vector.extract_strided_slice %75 {offsets = [15, 0], sizes = [1, 16], strides = [1, 1]} : vector<16x16xf32> to vector<1x16xf32>
    %224 = vector.extract_strided_slice %81 {offsets = [15, 0], sizes = [1, 16], strides = [1, 1]} : vector<16x16xf32> to vector<1x16xf32>
    %225 = tpu.concatenate %217, %218, %219, %220, %221, %222, %223, %224 in 0 : vector<1x16xf32>, vector<1x16xf32>, vector<1x16xf32>, vector<1x16xf32>, vector<1x16xf32>, vector<1x16xf32>, vector<1x16xf32>, vector<1x16xf32> -> vector<8x16xf32>
    %226 = tpu.concatenate %90, %99, %108, %117, %126, %135, %144, %153, %162, %171, %180, %189, %198, %207, %216, %225 in 1 : vector<8x16xf32>, vector<8x16xf32>, vector<8x16xf32>, vector<8x16xf32>, vector<8x16xf32>, vector<8x16xf32>, vector<8x16xf32>, vector<8x16xf32>, vector<8x16xf32>, vector<8x16xf32>, vector<8x16xf32>, vector<8x16xf32>, vector<8x16xf32>, vector<8x16xf32>, vector<8x16xf32>, vector<8x16xf32> -> vector<8x256xf32>
    %c0_32 = arith.constant 0 : index
    %c0_33 = arith.constant 0 : index
    %227 = vector.load %arg9[%c0_32, %c0_33] : memref<32x8xf32, #tpu.memory_space<vmem>>, vector<32x8xf32>
    %cst_34 = arith.constant dense<0.000000e+00> : vector<32x256xf32>
    %228 = tpu.matmul %227, %226, %cst_34 {dimension_numbers = #tpu.dot_dimension_numbers<[1], [0], [0], [1], [0, 0, 1, 1], [], []>} : vector<32x8xf32>, vector<8x256xf32>, vector<32x256xf32> -> vector<32x256xf32>
    %c0_35 = arith.constant 0 : index
    %c0_36 = arith.constant 0 : index
    %229 = vector.load %arg10[%c0_35, %c0_36] : memref<32x1xf32, #tpu.memory_space<vmem>>, vector<32x1xf32>
    %230 = vector.broadcast %229 : vector<32x1xf32> to vector<32x256xf32>
    %231 = arith.addf %228, %230 : vector<32x256xf32>
    %cst_37 = arith.constant 0.000000e+00 : f32
    %232 = vector.broadcast %cst_37 : f32 to vector<32x256xf32>
    %233 = arith.maximumf %231, %232 : vector<32x256xf32>
    %c0_38 = arith.constant 0 : index
    %c0_39 = arith.constant 0 : index
    %234 = vector.load %arg11[%c0_38, %c0_39] : memref<32x32xf32, #tpu.memory_space<vmem>>, vector<32x32xf32>
    %cst_40 = arith.constant dense<0.000000e+00> : vector<32x256xf32>
    %235 = tpu.matmul %234, %233, %cst_40 {dimension_numbers = #tpu.dot_dimension_numbers<[1], [0], [0], [1], [0, 0, 1, 1], [], []>} : vector<32x32xf32>, vector<32x256xf32>, vector<32x256xf32> -> vector<32x256xf32>
    %c0_41 = arith.constant 0 : index
    %c0_42 = arith.constant 0 : index
    %236 = vector.load %arg12[%c0_41, %c0_42] : memref<32x1xf32, #tpu.memory_space<vmem>>, vector<32x1xf32>
    %237 = vector.broadcast %236 : vector<32x1xf32> to vector<32x256xf32>
    %238 = arith.addf %235, %237 : vector<32x256xf32>
    %cst_43 = arith.constant 0.000000e+00 : f32
    %239 = vector.broadcast %cst_43 : f32 to vector<32x256xf32>
    %240 = arith.maximumf %238, %239 : vector<32x256xf32>
    %c0_44 = arith.constant 0 : index
    %c0_45 = arith.constant 0 : index
    %241 = vector.load %arg13[%c0_44, %c0_45] : memref<1x32xf32, #tpu.memory_space<vmem>>, vector<1x32xf32>
    %cst_46 = arith.constant dense<0.000000e+00> : vector<1x256xf32>
    %242 = tpu.matmul %241, %240, %cst_46 {dimension_numbers = #tpu.dot_dimension_numbers<[1], [0], [0], [1], [0, 0, 1, 1], [], []>} : vector<1x32xf32>, vector<32x256xf32>, vector<1x256xf32> -> vector<1x256xf32>
    %c0_47 = arith.constant 0 : index
    %243 = memref.load %arg14[%c0_47] : memref<1xf32, #tpu.memory_space<smem>>
    %244 = vector.broadcast %243 : f32 to vector<1x256xf32>
    %245 = arith.addf %242, %244 : vector<1x256xf32>
    %c0_48 = arith.constant 0 : index
    %c0_49 = arith.constant 0 : index
    %c0_50 = arith.constant 0 : index
    %246 = vector.load %arg15[%c0_48, %c0_49, %c0_50] : memref<1x1x256xf32, #tpu.memory_space<vmem>>, vector<1x1x256xf32>
    %247 = vector.shape_cast %246 : vector<1x1x256xf32> to vector<1x256xf32>
    %248 = vector.shape_cast %245 : vector<1x256xf32> to vector<1x1x256xf32>
    tpu.vector_store %arg15[%c0_48, %c0_49, %c0_50], %248 {strides = array<i32>} : memref<1x1x256xf32, #tpu.memory_space<vmem>>, vector<1x1x256xf32>,
    return
  }
  func.func @transform_0(%arg0: i32) -> (i32, i32, i32) {
    %c0_i32 = arith.constant 0 : i32
    %c0_i32_0 = arith.constant 0 : i32
    %c0_i32_1 = arith.constant 0 : i32
    return %arg0, %c0_i32, %c0_i32_0 : i32, i32, i32
  }
  func.func @transform_1(%arg0: i32) -> (i32, i32, i32) {
    %c0_i32 = arith.constant 0 : i32
    %c0_i32_0 = arith.constant 0 : i32
    %c0_i32_1 = arith.constant 0 : i32
    return %arg0, %c0_i32, %c0_i32_0 : i32, i32, i32
  }
  func.func @transform_2(%arg0: i32) -> (i32, i32) {
    %c0_i32 = arith.constant 0 : i32
    %c0_i32_0 = arith.constant 0 : i32
    %c0_i32_1 = arith.constant 0 : i32
    return %c0_i32, %c0_i32_0 : i32, i32
  }
  func.func @transform_3(%arg0: i32) -> (i32, i32) {
    %c0_i32 = arith.constant 0 : i32
    %c0_i32_0 = arith.constant 0 : i32
    %c0_i32_1 = arith.constant 0 : i32
    return %c0_i32, %c0_i32_0 : i32, i32
  }
  func.func @transform_4(%arg0: i32) -> (i32, i32) {
    %c0_i32 = arith.constant 0 : i32
    %c0_i32_0 = arith.constant 0 : i32
    %c0_i32_1 = arith.constant 0 : i32
    return %c0_i32, %c0_i32_0 : i32, i32
  }
  func.func @transform_5(%arg0: i32) -> (i32, i32) {
    %c0_i32 = arith.constant 0 : i32
    %c0_i32_0 = arith.constant 0 : i32
    %c0_i32_1 = arith.constant 0 : i32
    return %c0_i32, %c0_i32_0 : i32, i32
  }
  func.func @transform_6(%arg0: i32) -> (i32, i32) {
    %c0_i32 = arith.constant 0 : i32
    %c0_i32_0 = arith.constant 0 : i32
    %c0_i32_1 = arith.constant 0 : i32
    return %c0_i32, %c0_i32_0 : i32, i32
  }
  func.func @transform_7(%arg0: i32) -> (i32, i32) {
    %c0_i32 = arith.constant 0 : i32
    %c0_i32_0 = arith.constant 0 : i32
    %c0_i32_1 = arith.constant 0 : i32
    return %c0_i32, %c0_i32_0 : i32, i32
  }
  func.func @transform_8(%arg0: i32) -> (i32, i32) {
    %c0_i32 = arith.constant 0 : i32
    %c0_i32_0 = arith.constant 0 : i32
    %c0_i32_1 = arith.constant 0 : i32
    return %c0_i32, %c0_i32_0 : i32, i32
  }
  func.func @transform_9(%arg0: i32) -> (i32, i32) {
    %c0_i32 = arith.constant 0 : i32
    %c0_i32_0 = arith.constant 0 : i32
    %c0_i32_1 = arith.constant 0 : i32
    return %c0_i32, %c0_i32_0 : i32, i32
  }
  func.func @transform_10(%arg0: i32) -> (i32, i32) {
    %c0_i32 = arith.constant 0 : i32
    %c0_i32_0 = arith.constant 0 : i32
    %c0_i32_1 = arith.constant 0 : i32
    return %c0_i32, %c0_i32_0 : i32, i32
  }
  func.func @transform_11(%arg0: i32) -> (i32, i32) {
    %c0_i32 = arith.constant 0 : i32
    %c0_i32_0 = arith.constant 0 : i32
    %c0_i32_1 = arith.constant 0 : i32
    return %c0_i32, %c0_i32_0 : i32, i32
  }
  func.func @transform_12(%arg0: i32) -> (i32, i32) {
    %c0_i32 = arith.constant 0 : i32
    %c0_i32_0 = arith.constant 0 : i32
    %c0_i32_1 = arith.constant 0 : i32
    return %c0_i32, %c0_i32_0 : i32, i32
  }
  func.func @transform_13(%arg0: i32) -> i32 {
    %c0_i32 = arith.constant 0 : i32
    %c0_i32_0 = arith.constant 0 : i32
    return %c0_i32 : i32
  }
  func.func @transform_14(%arg0: i32) -> (i32, i32, i32) {
    %c0_i32 = arith.constant 0 : i32
    %c0_i32_0 = arith.constant 0 : i32
    %c0_i32_1 = arith.constant 0 : i32
    return %arg0, %c0_i32, %c0_i32_0 : i32, i32, i32
  }
}

</mosaic_0001>

<bundles_post_ra>
// kernel: tpu_custom_call.1
= control target key start
LH: loop header
LB: loop body
LE: loop exit
PB: predicated region body
PF: predicated region fallthrough
CT: control target
= control target key end

     0   :  { %s4277_s0 = inlined_call_operand.vmem [shape: f32[2,16,32], index: 0, kind: input, shape index: {}]   ;;  %s4278_s1 = inlined_call_operand.hbm [shape: f32[2,16,32], index: 1, kind: input, shape index: {}]   ;;  %s4279_s2 = inlined_call_operand.hbm [shape: f32[32,32], index: 2, kind: input, shape index: {}]   ;;  %s4280_s3 = inlined_call_operand.hbm [shape: f32[32,32], index: 3, kind: input, shape index: {}]   ;;  %s4281_s4 = inlined_call_operand.hbm [shape: f32[32,32], index: 4, kind: input, shape index: {}]   ;;  %s4282_s5 = inlined_call_operand.hbm [shape: f32[32,32], index: 5, kind: input, shape index: {}]   ;;  %s4283_s6 = inlined_call_operand.vmem [shape: f32[32,256], index: 6, kind: input, shape index: {}]   ;;  %s4284_s7 = inlined_call_operand.hbm [shape: f32[32,256], index: 7, kind: input, shape index: {}]   ;;  %s4285_s8 = inlined_call_operand.vmem [shape: f32[32,8], index: 8, kind: input, shape index: {}]   ;;  %s4286_s9 = inlined_call_operand.vmem [shape: f32[32,1], index: 9, kind: input, shape index: {}]   ;;  %s4287_s10 = inlined_call_operand.hbm [shape: f32[32,32], index: 10, kind: input, shape index: {}]   ;;  %s4288_s11 = inlined_call_operand.vmem [shape: f32[32,1], index: 11, kind: input, shape index: {}]   ;;  %s4289_s12 = inlined_call_operand.vmem [shape: f32[1,32], index: 12, kind: input, shape index: {}]   ;;  %s4290_s13 = inlined_call_operand.<no memory space> [shape: f32[1], index: 13, kind: input, shape index: {}]   ;;  %s4291_s14 = inlined_call_operand.hbm [shape: f32[2,1,256], index: 14, kind: output, shape index: {}]  }
   0x1   :  { %4303 = sst [smem:[#allocation24_spill]] %s4279_s2 }
   0x2   :  { %4304 = sst [smem:[#allocation25_spill]] %s4280_s3 }
   0x3   :  { %4305 = sst [smem:[#allocation26_spill]] %s4281_s4 }
   0x4   :  { %4306 = sst [smem:[#allocation27_spill]] %s4282_s5 }
   0x5   :  { %4307 = sst [smem:[#allocation28_spill]] %s4284_s7 }
   0x6   :  { %4308 = sst [smem:[#allocation29_spill]] %s4287_s10 }
   0x7   :  { %19 = sst [smem:[#allocation2]] %s4290_s13 }
   0x8   :  { %20 = vsyncpa [#allocation4], 0 }
   0x9   :  { %22 = vsyncpa [#allocation4 + $0x1], 0 }
   0xa   :  { %23 = vsyncpa [#allocation7], 0 }
   0xb   :  { %24 = vsyncpa [#allocation10], 0 }
   0xc   :  { %25 = vsyncpa [#allocation13], 0 }
   0xd   :  { %26 = vsyncpa [#allocation5], 0 }
   0xe   :  { %28 = vsyncpa [#allocation5 + $0x1], 0  ;;  %s3542_s15 = smov 0   ;;  %s3544_s16 = smov 0  }
   0xf   :  { %s3546_s17 = smov 0   ;;  %s3548_s18 = smov 0  }
  0x10 LB: > { %4309 = sst [smem:[#allocation21_spill]] %s3435_s17  ;;  %s3441_s13 = smov [#allocation6]   ;;  %s3439_s18 = sphi %s3548_s18, %s4339_s18   ;;  %s3435_s17 = sphi %s3546_s17, %s4341_s17   ;;  %s3431_s16 = sphi %s3544_s16, %s4343_s16   ;;  %s3427_s15 = sphi %s3542_s15, %s4342_s15  }
  0x11   : > { %s381_s19 = sshll.u32 %s3441_s13, 4  ;;  %s3563_s20 = sadd.s32 4294967295, %s3439_s18   ;;  %s382_s19 = int_to_ptr.vmem [resolvable:$true] %s381_s19 }
  0x12   : > { %p2820_p0 = scmp.ge.s32.totalorder %s3439_s18, 1  ;;  %p4297_p1 = scmp.eq.s32.totalorder %s3563_s20, 0 }
  0x13   : > { %p369_p2 = scmp.lt.s32.totalorder %s3439_s18, 3  ;;  %s3442_s22 = smov [#allocation9]  }
  0x14   : > { %s407_s23 = sshll.u32 %s3442_s22, 4  ;;  %s3443_s25 = smov [#allocation12]   ;;  %s3581_s23 = int_to_ptr.vmem [resolvable:$true] %s407_s23 }
  0x15   : > { %p3568_p3 = pnand %p2820_p0, %p369_p2  ;;  %s436_s26 = sshll.u32 %s3443_s25, 4  ;;  %s3583_s26 = int_to_ptr.vmem [resolvable:$true] %s436_s26 }
  0x16   : > { %s3190_s28 = scalar_lea.vmem %s382_s19, 512  ;;  %p3198_p11 = scmp.lt.s32.totalorder %s382_s19, %s382_s19 }
  0x17   : > { %s4310_s21 = scalar_select %p3568_p3, 1, 0 }
  0x18   : > { %p3083_p5 = pneg %p3568_p3  ;;  %p3191_p8 = scmp.ne.s32.totalorder %s382_s19, %s3190_s28 }
  0x19   : > { %p3199_p12 = scmp.lt.s32.totalorder %s3190_s28, %s3190_s28 }
  0x1a   : > { %p3577_p6 = pnand %p3083_p5, %p4297_p1 }
  0x1b   : > { %p3200_p13 = por %p3199_p12, %p3198_p11 }
  0x1c   : > { %p3587_p7 = pneg %p3577_p6 }
  0x1e   : > { %p3193_p9 = pnand %p3191_p8, %p3587_p7 }
  0x20   : > { %p3194_p10 = pneg %p3193_p9 }
  0x22   : > { %p3201_p0 = pnand %p3200_p13, %p3194_p10 }
  0x24   : > { %3204 = shalt.err (!%p3201_p0)
}
  0x25   : > { %s4292_s29 = smov 128   ;;  %s4294_s30 = smov 8  }
  0x26   : > { %s4313_s2 = sld [smem:[#allocation24_spill]]  ;;  %s3216_s25 = scalar_lea.vmem %s3581_s23, 512 }
  0x27   : > { %p3217_p2 = scmp.ne.s32.totalorder %s3581_s23, %s3216_s25  ;;  %p3224_p9 = scmp.lt.s32.totalorder %s3581_s23, %s3581_s23 }
  0x28   : > { %p3225_p10 = scmp.lt.s32.totalorder %s3216_s25, %s3216_s25 }
  0x29   : > { %p3219_p5 = pnand %p3217_p2, %p3587_p7 }
  0x2a   : > { %p3226_p11 = por %p3225_p10, %p3224_p9 }
  0x2b   : > { %p3220_p8 = pneg %p3219_p5 }
  0x2c   : > { %3086 = dma.hbm_to_vmem [thread:$0]  (!%p3577_p6), %s4313_s2, 512, %s382_s19, [#allocation7], %s4292_s29, %s4292_s29, %s4294_s30  }
  0x2d   : > { %p3227_p12 = pnand %p3226_p11, %p3220_p8 }
  0x2f   : > { %3230 = shalt.err (!%p3227_p12)
}
  0x30   : > { %s4314_s4 = sld [smem:[#allocation26_spill]]  ;;  %s3242_s19 = scalar_lea.vmem %s3583_s26, 1024 }
  0x31   : > { %p3243_p13 = scmp.ne.s32.totalorder %s3583_s26, %s3242_s19  ;;  %p3250_p5 = scmp.lt.s32.totalorder %s3583_s26, %s3583_s26 }
  0x32   : > { %p3251_p8 = scmp.lt.s32.totalorder %s3242_s19, %s3242_s19 }
  0x33   : > { %p3245_p0 = pnand %p3243_p13, %p3587_p7 }
  0x34   : > { %p3252_p9 = por %p3251_p8, %p3250_p5 }
  0x35   : > { %p3246_p2 = pneg %p3245_p0 }
  0x36   : > { %3092 = dma.hbm_to_vmem [thread:$0]  (!%p3577_p6), %s4314_s4, 512, %s3581_s23, [#allocation10], %s4292_s29, %s4292_s29, %s4294_s30  }
  0x37   : > { %p3253_p10 = pnand %p3252_p9, %p3246_p2 }
  0x39   : > { %3256 = shalt.err (!%p3253_p10)
}
  0x3a   : > { %s3446_s22 = smov 256   ;;  %s3447_s25 = smov 16  }
  0x3b   : > { %s4315_s7 = sld [smem:[#allocation28_spill]]  ;;  %s3448_s23 = smov [#allocation8]  }
  0x3c   : > { %s394_s29 = sshll.u32 %s3448_s23, 4  ;;  %s3449_s30 = smov [#allocation11]   ;;  %s395_s29 = int_to_ptr.vmem [resolvable:$true] %s394_s29 }
  0x3d   : > { %s420_s2 = sshll.u32 %s3449_s30, 4  ;;  %s3268_s4 = scalar_lea.vmem %s395_s29, 512  ;;  %s421_s2 = int_to_ptr.vmem [resolvable:$true] %s420_s2 }
  0x3e   : > { %p3269_p11 = scmp.ne.s32.totalorder %s395_s29, %s3268_s4  ;;  %p3276_p0 = scmp.lt.s32.totalorder %s395_s29, %s395_s29 }
  0x3f   : > { %p3277_p2 = scmp.lt.s32.totalorder %s3268_s4, %s3268_s4 }
  0x40   : > { %p3271_p12 = pnand %p3269_p11, %p3587_p7 }
  0x41   : > { %3098 = dma.hbm_to_vmem [thread:$0]  (!%p3577_p6), %s4315_s7, 1024, %s3583_s26, [#allocation13], %s3446_s22, %s3446_s22, %s3447_s25  }
  0x42   : > { %p3272_p13 = pneg %p3271_p12  ;;  %p3278_p5 = por %p3277_p2, %p3276_p0 }
  0x44   : > { %p3279_p8 = pnand %p3278_p5, %p3272_p13 }
  0x46   : > { %3282 = shalt.err (!%p3279_p8)
}
  0x47   : > { %s4316_s19 = smov 8   ;;  %s4317_s28 = smov 128  }
  0x48   : > { %s4318_s3 = sld [smem:[#allocation25_spill]]  ;;  %s3294_s30 = scalar_lea.vmem %s421_s2, 512 }
  0x49   : > { %p3295_p9 = scmp.ne.s32.totalorder %s421_s2, %s3294_s30  ;;  %p3302_p12 = scmp.lt.s32.totalorder %s421_s2, %s421_s2 }
  0x4a   : > { %p3303_p0 = scmp.lt.s32.totalorder %s3294_s30, %s3294_s30 }
  0x4b   : > { %p3297_p10 = pnand %p3295_p9, %p3587_p7 }
  0x4c   : > { %p3304_p13 = por %p3303_p0, %p3302_p12 }
  0x4d   : > { %p3298_p11 = pneg %p3297_p10 }
  0x4e   : > { %3089 = dma.hbm_to_vmem [thread:$0]  (!%p3577_p6), %s4318_s3, 512, %s395_s29, [#allocation7], %s4317_s28, %s4317_s28, %s4316_s19  }
  0x4f   : > { %p3305_p2 = pnand %p3304_p13, %p3298_p11 }
  0x51   : > { %3308 = shalt.err (!%p3305_p2)
}
  0x52   : > { %s4319_s5 = sld [smem:[#allocation27_spill]]  ;;  %s3450_s29 = smov [#allocation14]  }
  0x53   : > { %s455_s13 = sshll.u32 %s3450_s29, 4  ;;  %s456_s13 = int_to_ptr.vmem [resolvable:$true] %s455_s13 }
  0x54   : > { %s3320_s23 = scalar_lea.vmem %s456_s13, 512  ;;  %p3328_p10 = scmp.lt.s32.totalorder %s456_s13, %s456_s13 }
  0x55   : > { %p3321_p5 = scmp.ne.s32.totalorder %s456_s13, %s3320_s23  ;;  %p3329_p11 = scmp.lt.s32.totalorder %s3320_s23, %s3320_s23 }
  0x57   : > { %p3323_p8 = pnand %p3321_p5, %p3587_p7  ;;  %p3330_p12 = por %p3329_p11, %p3328_p10 }
  0x58   : > { %3095 = dma.hbm_to_vmem [thread:$0]  (!%p3577_p6), %s4319_s5, 512, %s421_s2, [#allocation10], %s4317_s28, %s4317_s28, %s4316_s19  }
  0x59   : > { %p3324_p9 = pneg %p3323_p8 }
  0x5b   : > { %p3331_p0 = pnand %p3330_p12, %p3324_p9 }
  0x5d   : > { %3334 = shalt.err (!%p3331_p0)
}
  0x5e   : > { %s4320_s10 = sld [smem:[#allocation29_spill]]  ;;  %s2819_s24 = sadd.s32 4294967294, %s3439_s18  }
  0x5f   : > { %s3660_s27 = sadd.s32 1, %s3439_s18   ;;  %s67_s30 = sadd.s32 1, %s3435_s17 }
  0x60   : > { %4321 = sst [smem:[#allocation22_spill]] %s3660_s27  ;;  %s64_s22 = ssub.s32 %s3439_s18, %s3660_s27 }
  0x61   : > { %p65_p7 = scmp.eq.s32.totalorder %s64_s22, 0  ;;  %p74_p13 = scmp.ne.s32.totalorder %s3435_s17, %s3431_s16 }
  0x62   : > { %p75_p2 = scmp.eq.s32.totalorder %s3439_s18, 0  ;;  %p80_p5 = scmp.ne.s32.totalorder %s3431_s16, %s3427_s15 }
  0x63   : > { %s3671_s4 = scalar_select %p65_p7, %s3435_s17, %s67_s30  }
  0x64   : > { %3101 = dma.hbm_to_vmem [thread:$0]  (!%p3577_p6), %s4320_s10, 512, %s456_s13, [#allocation13], %s4317_s28, %s4317_s28, %s4316_s19  }
  0x65   : > { %4322 = sst [smem:[#allocation23_spill]] %s3671_s4  ;;  %p3673_p8 = por %p75_p2, %p74_p13 }
  0x66   : > { %p3679_p6 = por %p4297_p1, %p80_p5  ;;  %p356_p9 = scmp.eq.s32.totalorder %s3563_s20, 1 }
  0x67   : > { %p362_p10 = scmp.eq.s32.totalorder %s2819_s24, 1  ;;  %p3116_p11 = scmp.lt.s32.totalorder %s3439_s18, 2 }
  0x68   : > { %s4324_s29 = scalar_select %p3679_p6, 1, 0 }
  0x69   : > { %s486_s13 = sand.u32 1, %s3435_s17   ;;  %p3686_p12 = por %p356_p9, %p74_p13 }
  0x6a   : > { %p3690_p0 = por %p362_p10, %p80_p5  ;;  %s2828_s2 = sshll.u32 %s486_s13, 4 }
  0x6b   : > { %s4325_s23 = scalar_select %p3686_p12, 1, 0 }
  0x6c   : > { %s4326_s26 = scalar_select %p3690_p0, 1, 0 }
  0x6d   : > { %s2898_s22 = sshll.u32 %s3439_s18, 8  ;;  %s490_s24 = scalar_lea.vmem [#allocation3], %s2828_s2 }
  0x6e   : > { %s3698_s5 = scalar_lea.hbm %s4278_s1, %s2898_s22  ;;  %s497_s7 = sshll.u32 %s490_s24, 4  ;;  %s3700_s7 = int_to_ptr.vmem [resolvable:$true] %s497_s7 }
  0x6f   : > { %p3704_p7 = pnand %p3116_p11, %p3673_p8  ;;  %s3708_s4 = scalar_lea.sflag [#allocation4], %s486_s13 }
  0x70   : > { %s3335_s17 = scalar_lea.hbm %s3698_s5, 256  ;;  %s3340_s2 = scalar_lea.hbm %s4278_s1, 512 }
  0x71   : > { %p3336_p13 = scmp.ne.s32.totalorder %s3698_s5, %s3335_s17  ;;  %p3337_p2 = pneg %p3704_p7 }
  0x72   : > { %p3341_p8 = scmp.lt.s32.totalorder %s3698_s5, %s4278_s1  ;;  %p3342_p10 = scmp.lt.s32.totalorder %s3340_s2, %s3335_s17 }
  0x73   : > { %p3338_p5 = pnand %p3337_p2, %p3336_p13 }
  0x74   : > { %p3343_p11 = por %p3342_p10, %p3341_p8 }
  0x75   : > { %p3339_p9 = pneg %p3338_p5 }
  0x77   : > { %p3344_p4 = pnand %p3343_p11, %p3339_p9 }
  0x79   : > { %3347 = shalt.err (!%p3344_p4)
}
  0x7a   : > { %s3348_s25 = scalar_lea.vmem %s3700_s7, 256  ;;  %s3451_s13 = smov [#allocation3]  }
  0x7b   : > { %p3349_p1 = scmp.ne.s32.totalorder %s3700_s7, %s3348_s25  ;;  %s3353_s27 = sshll.u32 %s3451_s13, 4  ;;  %s3354_s27 = int_to_ptr.vmem [resolvable:$false] %s3353_s27 }
  0x7c   : > { %s3355_s3 = scalar_lea.vmem %s3354_s27, 512  ;;  %p3356_p5 = scmp.lt.s32.totalorder %s3700_s7, %s3354_s27 }
  0x7d   : > { %p3351_p0 = pnand %p3349_p1, %p3337_p2  ;;  %p3357_p12 = scmp.lt.s32.totalorder %s3355_s3, %s3348_s25 }
  0x7f   : > { %p3352_p13 = pneg %p3351_p0  ;;  %p3358_p6 = por %p3357_p12, %p3356_p5 }
  0x81   : > { %p3359_p3 = pnand %p3358_p6, %p3352_p13 }
  0x83   : > { %3362 = shalt.err (!%p3359_p3)
}
  0x84   : > { %3105 = dma.hbm_to_vmem [thread:$0]  (!%p3704_p7), %s3698_s5, 256, %s3700_s7, %s3708_s4, %s4317_s28, %s4317_s28, %s4316_s19  }
  0x85   : > { %p4328_p1 = scmp.ne.s32.totalorder %s4310_s21, 0 }
  0x86   : > { %s3735_s17 = sand.u32 (!%p4328_p1), 1, %s3431_s16   ;;  %p4329_p3 = scmp.ne.s32.totalorder (!%p4328_p1), %s4324_s29, 0 }
  0x87   : > { %509 = sbr.rel (%p4328_p1) target bundleno = 1721 (0x6b9), region = 76  ;;  %s2832_s27 = sshll.u32 (!%p4328_p1), %s3735_s17, 4 }
  0x88   : > { %s512_s22 = scalar_lea.sflag (!%p4328_p1), [#allocation4], %s3735_s17  ;;  %s515_s2 = scalar_lea.vmem (!%p4328_p1), [#allocation3], %s2832_s27 }
  0x8c   : > { %3406 = dma.done.wait (%p4329_p3), %s512_s22, 256  }
  0x8d   : > { %3408 = vsyncadd (%p4329_p3), %s512_s22, 4294967040  ;;  %p4330_p4 = scmp.eq.s32.totalorder %s3563_s20, 0 }
  0x8f   : > { %3410 = dma.done.wait (%p4330_p4), [#allocation7], 1024   ;;  %p4331_p6 = pmov %p4330_p4 }
  0x90   : > { %p4332_p12 = pmov %p4330_p4 }
  0x91   : > { %3412 = vsyncadd (%p4331_p6), [#allocation7], 4294966272 }
  0x92   : > { %3414 = dma.done.wait (%p4332_p12), [#allocation10], 1024   ;;  %p4333_p0 = pmov %p4330_p4 }
  0x94   : > { %3416 = vsyncadd (%p4333_p0), [#allocation10], 4294966272  ;;  %p4334_p7 = pmov %p4333_p0 }
  0x95   : > { %p4335_p2 = pmov %p4333_p0 }
  0x96   : > { %3418 = dma.done.wait (%p4334_p7), [#allocation13], 1536  }
  0x97   : > { %3420 = vsyncadd (%p4335_p2), [#allocation13], 4294965760  ;;  %p589_p9 = scmp.lt.s32.totalorder %s3563_s20, 1  ;;  %v3452_v0 = vmov 0.0   ;;  %vm3453_vm0 = vmmov 0   ;;  %v697_v1 = vld [vmem:[#allocation11 + $0x18] sm:$0xff]  ;;  %v856_v55 = vlaneseq }
  0x98   : > { %2966 = vmatprep.subr.mxu1 %v3452_v0  ;;  %2955 = vmatprep.subr.mxu0 %v3452_v0  ;;  %v696_v2 = vld [vmem:[#allocation11 + $0x10] sm:$0xff]  ;;  %vm598_vm1 = vcmask 261120   ;;  %v695_v3 = vld [vmem:[#allocation11 + $0x8] sm:$0xff]  ;;  %v611_v4 = vld [vmem:[#allocation8 + $0x18] sm:$0xff]  ;;  %s3454_s28 = smov 64   ;;  %s3455_s4 = smov 96  }
  0x99   : > { %2974 = vmatprep.mubr.msk.f32.mxu1 %vm3453_vm0, %v3452_v0  ;;  %2963 = vmatprep.mubr.msk.f32.mxu0 %vm3453_vm0, %v3452_v0  ;;  %s590_s5 = scalar_select %p589_p9, %s3563_s20, 1  ;;  %v610_v5 = vld [vmem:[#allocation8 + $0x10] sm:$0xff]  ;;  %v597_v7 = vld [vmem:[%s515_s2 + $0x8] sm:$0xff]  ;;  %v694_v11 = vld [vmem:[#allocation11] sm:$0xff]  ;;  %v3807_v57 = vshrl.u32 %v856_v55, 7  ;;  %vm1876_vm2 = vcmask 1040384  }
  0x9a   : > { %2967 = vmatpush3.msra.mxu1 %v697_v1  ;;  %2956 = vmatpush3.msra.mxu0 %v611_v4  ;;  %v596_v6 = vld [vmem:[%s515_s2] sm:$0xff]  ;;  %v686_v9 = vsel %vm598_vm1, %v597_v7, -inf  ;;  %v609_v10 = vld [vmem:[#allocation8 + $0x8] sm:$0xff]  ;;  %v865_v12 = vld [vmem:[#allocation9 + $0x18] sm:$0xff]  ;;  %s3456_s29 = smov 32   ;;  %vm1878_vm3 = vcmask 1041408  }
  0x9b   : > { %s2899_s7 = sshll.u32 %s590_s5, 4  ;;  %2968 = vmatprep.subr.mxu1 %v3452_v0  ;;  %2957 = vmatprep.subr.mxu0 %v3452_v0  ;;  %v685_v8 = vsel %vm598_vm1, %v596_v6, -inf  ;;  %v608_v14 = vld [vmem:[#allocation8] sm:$0xff]  ;;  %v774_v18 = vld [vmem:[#allocation6 + $0x18] sm:$0xff]  ;;  %v864_v31 = vld [vmem:[#allocation9 + $0x10] sm:$0xff]  ;;  %v858_v60 = vsub.s32 0, %v3807_v57 }
  0x9c   : > { %s593_s19 = scalar_lea.vmem %s4277_s0, %s2899_s7  ;;  %2969 = vmatpush3.msra.mxu1 %v696_v2  ;;  %2958 = vmatpush3.msra.mxu0 %v610_v5  ;;  %v687_v13 = vmax.f32 %v685_v8, %v686_v9  ;;  %v863_v33 = vld [vmem:[#allocation9 + $0x8] sm:$0xff]  ;;  %v773_v35 = vld [vmem:[#allocation6 + $0x10] sm:$0xff]  ;;  %v862_v36 = vld [vmem:[#allocation9] sm:$0xff]  ;;  %vm1880_vm4 = vcmask 1042432   ;;  %vm1882_vm5 = vcmask 1043456   ;;  %vm1884_vm6 = vcmask 1044480  }
  0x9d   : > { %2970 = vmatprep.subr.mxu1 %v3452_v0  ;;  %2959 = vmatprep.subr.mxu0 %v3452_v0  ;;  %v594_v15 = vld [vmem:[%s593_s19] sm:$0xff]  ;;  %v595_v16 = vld [vmem:[%s593_s19 + $0x8] sm:$0xff]  ;;  %v960_v39 = vld [vmem:[%s4283_s6 + $0x38] sm:$0xff]  ;;  %vm1886_vm7 = vcmask 1045504   ;;  %vm1888_vm8 = vcmask 1046528   ;;  %s3457_s30 = smov 16  }
  0x9e   : > { %2971 = vmatpush3.msra.mxu1 %v695_v3  ;;  %v688_v17 = vrot.slane %v687_v13, 4  ;;  %2960 = vmatpush3.msra.mxu0 %v609_v10  ;;  %v599_v19 = vsel %vm598_vm1, %v594_v15, -inf  ;;  %v600_v20 = vsel %vm598_vm1, %v595_v16, -inf  ;;  %v772_v37 = vld [vmem:[#allocation6 + $0x8] sm:$0xff]  ;;  %v771_v38 = vld [vmem:[#allocation6] sm:$0xff]  ;;  %v959_v40 = vld [vmem:[%s4283_s6 + $0x30] sm:$0xff] }
  0x9f   : > { %2972 = vmatprep.subr.mxu1 %v3452_v0  ;;  %2961 = vmatprep.subr.mxu0 %v3452_v0  ;;  %v601_v21 = vmax.f32 %v599_v19, %v600_v20  ;;  %v958_v41 = vld [vmem:[%s4283_s6 + $0x28] sm:$0xff]  ;;  %v957_v42 = vld [vmem:[%s4283_s6 + $0x20] sm:$0xff]  ;;  %v956_v43 = vld [vmem:[%s4283_s6 + $0x18] sm:$0xff]  ;;  %s3458_s24 = smov 48   ;;  %s3459_s25 = smov 80   ;;  %vm2270_vm9 = vcmask 130048  }
  0xa0   : > { %2973 = vmatpush3.msra.mxu1 %v694_v11  ;;  %v689_v22 = vmax.f32 %v687_v13, %v688_v17  ;;  %2962 = vmatpush3.msra.mxu0 %v608_v14  ;;  %v955_v44 = vld [vmem:[%s4283_s6 + $0x10] sm:$0xff]  ;;  %v954_v45 = vld [vmem:[%s4283_s6 + $0x8] sm:$0xff]  ;;  %v1051_v46 = vld [vmem:[#allocation12 + $0x38] sm:$0xff]  ;;  %s3460_s13 = smov 112   ;;  %vm2273_vm10 = vcmask 392192   ;;  %vm2275_vm11 = vcmask 523264  }
  0xa1   : > { %2988 = vmatprep.subr.mxu1 %v865_v12  ;;  %2977 = vmatprep.subr.mxu0 %v774_v18  ;;  %v602_v23 = vrot.slane %v601_v21, 4  ;;  %v953_v47 = vld [vmem:[%s4283_s6] sm:$0xff]  ;;  %v1050_v48 = vld [vmem:[#allocation12 + $0x30] sm:$0xff]  ;;  %v1049_v49 = vld [vmem:[#allocation12 + $0x28] sm:$0xff]  ;;  %vm2277_vm12 = vcmask 654336   ;;  %vm2279_vm13 = vcmask 785408  }
  0xa2   : > { %v690_v24 = vrot.slane %v689_v22, 2  ;;  %v1048_v50 = vld [vmem:[#allocation12 + $0x20] sm:$0xff]  ;;  %v1047_v51 = vld [vmem:[#allocation12 + $0x18] sm:$0xff]  ;;  %v1046_v52 = vld [vmem:[#allocation12 + $0x10] sm:$0xff]  ;;  %vm2281_vm14 = vcmask 916480   ;;  %vm2318_vm15 = vcmask 64512  }
  0xa3   : > { %v603_v25 = vmax.f32 %v601_v21, %v602_v23  ;;  %v1045_v53 = vld [vmem:[#allocation12 + $0x8] sm:$0xff]  ;;  %v1044_v54 = vld [vmem:[#allocation12] sm:$0xff]  ;;  %vm2662_vm0 = vcmp.lt.s32.totalorder %v856_v55, 256  ;;  %s2666_s22 = scalar_lea.sflag [#allocation5], %s3735_s17  ;;  %p4336_p10 = scmp.ne.s32.totalorder %s4325_s23, 0 }
  0xa4   : > { %v691_v26 = vmax.f32 %v689_v22, %v690_v24  ;;  %s3463_s5 = smov [#allocation15]  }
  0xa5   : > { %v604_v27 = vrot.slane %v603_v25, 2 }
  0xa6   : > { %v692_v28 = vrot.slane %v691_v26, 1 }
  0xa7   : > { %v605_v29 = vmax.f32 %v603_v25, %v604_v27 }
  0xa8   : > { %v693_v30 = vmax.f32 %v691_v26, %v692_v28 }
  0xa9   : > { %v606_v32 = vrot.slane %v605_v29, 1 }
  0xaa   : > { %2975 = vmatmul.mubr.msk.f32.vlgmr.msra.gmra.mxu1 %vm598_vm1, %v693_v30 }
  0xab   : > { %2989 = vmatpush3.msra.mxu1 %v865_v12  ;;  %v607_v34 = vmax.f32 %v605_v29, %v606_v32  ;;  %2996 = vmatprep.mubr.msk.f32.mxu1 %vm598_vm1, %v596_v6 }
  0xac   : > { %2990 = vmatprep.subr.mxu1 %v864_v31 }
  0xad   : > { %2991 = vmatpush3.msra.mxu1 %v864_v31  ;;  %2964 = vmatmul.mubr.msk.f32.vlgmr.msra.gmra.mxu0 %vm598_vm1, %v607_v34 }
  0xae   : > { %2992 = vmatprep.subr.mxu1 %v863_v33  ;;  %2978 = vmatpush3.msra.mxu0 %v774_v18 }
  0xaf   : > { %2993 = vmatpush3.msra.mxu1 %v863_v33  ;;  %2979 = vmatprep.subr.mxu0 %v773_v35 }
  0xb0   : > { %2994 = vmatprep.subr.mxu1 %v862_v36  ;;  %2980 = vmatpush3.msra.mxu0 %v773_v35 }
  0xb1   : > { %2995 = vmatpush3.msra.mxu1 %v862_v36  ;;  %2981 = vmatprep.subr.mxu0 %v772_v37 }
  0xb2   : > { %2997 = vmatmul.mubr.msk.f32.vlgmr.msra.gmra.mxu1 %vm598_vm1, %v597_v7  ;;  %2982 = vmatpush3.msra.mxu0 %v772_v37 }
  0xb3   : > { %2983 = vmatprep.subr.mxu0 %v771_v38  ;;  %2985 = vmatprep.mubr.msk.f32.mxu0 %vm598_vm1, %v594_v15 }
  0xb4   : > { %2984 = vmatpush3.msra.mxu0 %v771_v38  ;;  %1122 = vmatprep.mubr.f32.mxu1 %v3452_v0 }
  0xb5   : > { %2986 = vmatmul.mubr.msk.f32.vlgmr.msra.gmra.mxu0 %vm598_vm1, %v595_v16  ;;  %991 = vmatprep.subr.mxu0 %v960_v39 }
  0xb6   : > { %1031 = vmatprep.mubr.f32.mxu0 %v3452_v0  ;;  %992 = vmatpush1.msra.mxu0 %v959_v40 }
  0xb7   : > { %993 = vmatprep.subr.mxu0 %v958_v41  ;;  %1082 = vmatprep.subr.mxu1 %v1051_v46 }
  0xb8   : > { %994 = vmatpush1.msra.mxu0 %v957_v42  ;;  %1083 = vmatpush1.msra.mxu1 %v1050_v48 }
  0xb9   : > { %995 = vmatprep.subr.mxu0 %v956_v43  ;;  %1084 = vmatprep.subr.mxu1 %v1049_v49 }
  0xba   : > { %996 = vmatpush1.msra.mxu0 %v955_v44  ;;  %1085 = vmatpush1.msra.mxu1 %v1048_v50 }
  0xbb   : > { %997 = vmatprep.subr.mxu0 %v954_v45  ;;  %1086 = vmatprep.subr.mxu1 %v1047_v51 }
  0xbc   : > { %998 = vmatpush1.msra.mxu0 %v953_v47  ;;  %1087 = vmatpush1.msra.mxu1 %v1046_v52 }
  0xbd   : > { %1088 = vmatprep.subr.mxu1 %v1045_v53 }
  0xbe   : > { %1089 = vmatpush1.msra.mxu1 %v1044_v54 }
 0x16a   : > { %v767_v56 = vpop.f32.mrf.mxu1 }
 0x16b   : > { %v950_v63 = vrot.slane %v767_v56, %v858_v60 }
 0x16c   : > { %v2976_v58 = vpop.f32.mrf.mxu1 }
 0x16d   : > { %v681_v59 = vpop.f32.mrf.mxu0 }
 0x16e   : > { %v859_v1 = vrot.slane %v681_v59, %v858_v60 }
 0x16f   : > { %v2965_v61 = vpop.f32.mrf.mxu0 }
 0x172   : > { %v2998_v62 = vpop.f32.mrf.mxu1 }
 0x173   : > { %v952_v7 = vadd.f32 %v2998_v62, %v950_v63 }
 0x174   : > { %v938_v2 = vpop.f32.mrf.mxu1 }
 0x175   : > { %v951_v3 = vadd.f32 %v950_v63, %v938_v2  ;;  %v2987_v4 = vpop.f32.mrf.mxu0 }
 0x176   : > { %v861_v8 = vadd.f32 %v2987_v4, %v859_v1 }
 0x177   : > { %2848 = vmatmul.mubr.msk.f32.vlgmr.msra.gmra.mxu0 %vm598_vm1, %v951_v3  ;;  %v847_v5 = vpop.f32.mrf.mxu0 }
 0x178   : > { %v860_v6 = vadd.f32 %v859_v1, %v847_v5  ;;  %1037 = vmatprep.mubr.f32.mxu0 %v3452_v0 }
 0x17a   : > { %2850 = vmatmul.mubr.msk.f32.vlgmr.msra.gmra.mxu1 %vm598_vm1, %v860_v6 }
 0x17b   : > { %2849 = vmatmul.mubr.msk.f32.gmra.mxu0 %vm598_vm1, %v952_v7  ;;  %1128 = vmatprep.mubr.f32.mxu1 %v3452_v0 }
 0x17e   : > { %2851 = vmatmul.mubr.msk.f32.gmra.mxu1 %vm598_vm1, %v861_v8 }
 0x237   : > { %v1033_v9 = vpop.f32.mrf.mxu0 }
 0x238   : > { %1313 = vrot.lane.b32.xlu0 %v1033_v9, %s3454_s28  ;;  %1222 = vrot.lane.b32.xlu1 %v1033_v9, %s3455_s4 }
 0x239   : > { %3003 = vmatprep.mubr.msk.f32.mxu0 %vm598_vm1, %v1033_v9  ;;  %v1035_v10 = vpop.f32.mrf.mxu0 }
 0x23a   : > { %v1124_v13 = vpop.f32.mrf.mxu1 }
 0x23b   : > { %v1039_v11 = vpop.f32.mrf.mxu0 }
 0x23c   : > { %1408 = vrot.lane.b32.xlu1 %v1035_v10, %s3456_s29  ;;  %1226 = vrot.lane.b32.xlu0 %v1035_v10, %s3455_s4  ;;  %v1126_v14 = vpop.f32.mrf.mxu1 }
 0x23d   : > { %v1041_v12 = vpop.f32.mrf.mxu0 }
 0x23e   : > { %2999 = vmatprep.subr.msk.mxu0 %vm598_vm1, %v1041_v12  ;;  %v1130_v15 = vpop.f32.mrf.mxu1 }
 0x23f   : > { %3000 = vmatpush3.xpose.msk.msra.mxu0 %vm598_vm1, %v1041_v12 }
 0x240   : > { %1317 = vrot.lane.b32.xlu0 %v1035_v10, %s3454_s28  ;;  %1224 = vrot.lane.b32.xlu1 %v1039_v11, %s3455_s4  ;;  %v1132_v16 = vpop.f32.mrf.mxu1 }
 0x241   : > { %3001 = vmatprep.subr.msk.mxu0 %vm598_vm1, %v1035_v10 }
 0x243   : > { %3002 = vmatpush3.xpose.msk.msra.mxu0 %vm598_vm1, %v1035_v10 }
 0x244   : > { %1315 = vrot.lane.b32.xlu1 %v1039_v11, %s3454_s28  ;;  %1228 = vrot.lane.b32.xlu0 %v1041_v12, %s3455_s4 }
 0x246   : > { %3004 = vmatmul.mubr.msk.f32.vlgmr.msra.gmra.mxu0 %vm598_vm1, %v1039_v11 }
 0x248   : > { %1319 = vrot.lane.b32.xlu1 %v1041_v12, %s3454_s28  ;;  %1404 = vrot.lane.b32.xlu0 %v1033_v9, %s3456_s29 }
 0x24c   : > { %1410 = vrot.lane.b32.xlu0 %v1041_v12, %s3456_s29  ;;  %1586 = vrot.lane.b32.xlu1 %v1126_v14, %s3455_s4 }
 0x250   : > { %1406 = vrot.lane.b32.xlu0 %v1039_v11, %s3456_s29  ;;  %1582 = vrot.lane.b32.xlu1 %v1124_v13, %s3455_s4 }
 0x254   : > { %1677 = vrot.lane.b32.xlu0 %v1126_v14, %s3454_s28  ;;  %1588 = vrot.lane.b32.xlu1 %v1132_v16, %s3455_s4 }
 0x258   : > { %1679 = vrot.lane.b32.xlu0 %v1132_v16, %s3454_s28  ;;  %1584 = vrot.lane.b32.xlu1 %v1130_v15, %s3455_s4 }
 0x25c   : > { %1770 = vrot.lane.b32.xlu0 %v1132_v16, %s3456_s29  ;;  %1768 = vrot.lane.b32.xlu1 %v1126_v14, %s3456_s29 }
 0x260   : > { %1673 = vrot.lane.b32.xlu0 %v1124_v13, %s3454_s28  ;;  %1675 = vrot.lane.b32.xlu1 %v1130_v15, %s3454_s28 }
 0x264   : > { %1764 = vrot.lane.b32.xlu0 %v1124_v13, %s3456_s29  ;;  %1766 = vrot.lane.b32.xlu1 %v1130_v15, %s3456_s29 }
 0x2aa   : > { %v1314_v17 = vpop.permute.xlu0 %1313  ;;  %v1223_v18 = vpop.permute.xlu1 %1222 }
 0x2ab   : > { %3010 = vmatprep.mubr.msk.f32.mxu1 %vm598_vm1, %v1223_v18  ;;  %3017 = vmatprep.mubr.msk.f32.mxu0 %vm598_vm1, %v1314_v17 }
 0x2ae   : > { %v1409_v19 = vpop.permute.xlu1 %1408  ;;  %v1227_v20 = vpop.permute.xlu0 %1226 }
 0x2b2   : > { %v1318_v21 = vpop.permute.xlu0 %1317  ;;  %v1225_v22 = vpop.permute.xlu1 %1224 }
 0x2b6   : > { %v1316_v23 = vpop.permute.xlu1 %1315  ;;  %v1229_v24 = vpop.permute.xlu0 %1228 }
 0x2b7   : > { %3006 = vmatprep.subr.msk.mxu1 %vm598_vm1, %v1229_v24 }
 0x2b8   : > { %3007 = vmatpush3.xpose.msk.msra.mxu1 %vm598_vm1, %v1229_v24 }
 0x2b9   : > { %3008 = vmatprep.subr.msk.mxu1 %vm598_vm1, %v1227_v20 }
 0x2ba   : > { %v1320_v25 = vpop.permute.xlu1 %1319  ;;  %v1405_v26 = vpop.permute.xlu0 %1404 }
 0x2bb   : > { %3013 = vmatprep.subr.msk.mxu0 %vm598_vm1, %v1320_v25 }
 0x2bc   : > { %3009 = vmatpush3.xpose.msk.msra.mxu1 %vm598_vm1, %v1227_v20  ;;  %3014 = vmatpush3.xpose.msk.msra.mxu0 %vm598_vm1, %v1320_v25 }
 0x2bd   : > { %3015 = vmatprep.subr.msk.mxu0 %vm598_vm1, %v1318_v21 }
 0x2be   : > { %v1411_v27 = vpop.permute.xlu0 %1410  ;;  %v1587_v28 = vpop.permute.xlu1 %1586 }
 0x2bf   : > { %3011 = vmatmul.mubr.msk.f32.vlgmr.msra.gmra.mxu1 %vm598_vm1, %v1225_v22  ;;  %3020 = vmatprep.subr.msk.mxu1 %vm598_vm1, %v1411_v27 }
 0x2c0   : > { %3016 = vmatpush3.xpose.msk.msra.mxu0 %vm598_vm1, %v1318_v21  ;;  %3021 = vmatpush3.xpose.msk.msra.mxu1 %vm598_vm1, %v1411_v27 }
 0x2c1   : > { %3024 = vmatprep.mubr.msk.f32.mxu1 %vm598_vm1, %v1405_v26  ;;  %3022 = vmatprep.subr.msk.mxu1 %vm598_vm1, %v1409_v19 }
 0x2c2   : > { %3027 = vmatprep.subr.msk.mxu0 %vm598_vm1, %v1132_v16  ;;  %v1407_v29 = vpop.permute.xlu0 %1406  ;;  %v1583_v30 = vpop.permute.xlu1 %1582 }
 0x2c3   : > { %3018 = vmatmul.mubr.msk.f32.vlgmr.msra.gmra.mxu0 %vm598_vm1, %v1316_v23 }
 0x2c4   : > { %3023 = vmatpush3.xpose.msk.msra.mxu1 %vm598_vm1, %v1409_v19  ;;  %3028 = vmatpush3.xpose.msk.msra.mxu0 %vm598_vm1, %v1132_v16 }
 0x2c5   : > { %3031 = vmatprep.mubr.msk.f32.mxu0 %vm598_vm1, %v1124_v13  ;;  %3029 = vmatprep.subr.msk.mxu0 %vm598_vm1, %v1126_v14 }
 0x2c6   : > { %v1678_v31 = vpop.permute.xlu0 %1677  ;;  %v1589_v32 = vpop.permute.xlu1 %1588 }
 0x2c7   : > { %3025 = vmatmul.mubr.msk.f32.vlgmr.msra.gmra.mxu1 %vm598_vm1, %v1407_v29  ;;  %3034 = vmatprep.subr.msk.mxu1 %vm598_vm1, %v1589_v32 }
 0x2c8   : > { %3030 = vmatpush3.xpose.msk.msra.mxu0 %vm598_vm1, %v1126_v14  ;;  %3035 = vmatpush3.xpose.msk.msra.mxu1 %vm598_vm1, %v1589_v32 }
 0x2c9   : > { %3038 = vmatprep.mubr.msk.f32.mxu1 %vm598_vm1, %v1583_v30  ;;  %3036 = vmatprep.subr.msk.mxu1 %vm598_vm1, %v1587_v28 }
 0x2ca   : > { %v1680_v33 = vpop.permute.xlu0 %1679  ;;  %v1585_v34 = vpop.permute.xlu1 %1584 }
 0x2cb   : > { %3032 = vmatmul.mubr.msk.f32.vlgmr.msra.gmra.mxu0 %vm598_vm1, %v1130_v15  ;;  %3041 = vmatprep.subr.msk.mxu0 %vm598_vm1, %v1680_v33 }
 0x2cc   : > { %3037 = vmatpush3.xpose.msk.msra.mxu1 %vm598_vm1, %v1587_v28  ;;  %3042 = vmatpush3.xpose.msk.msra.mxu0 %vm598_vm1, %v1680_v33 }
 0x2cd   : > { %3043 = vmatprep.subr.msk.mxu0 %vm598_vm1, %v1678_v31 }
 0x2ce   : > { %v1771_v35 = vpop.permute.xlu0 %1770  ;;  %v1769_v36 = vpop.permute.xlu1 %1768 }
 0x2cf   : > { %3039 = vmatmul.mubr.msk.f32.vlgmr.msra.gmra.mxu1 %vm598_vm1, %v1585_v34  ;;  %3048 = vmatprep.subr.msk.mxu1 %vm598_vm1, %v1771_v35 }
 0x2d0   : > { %3044 = vmatpush3.xpose.msk.msra.mxu0 %vm598_vm1, %v1678_v31  ;;  %3049 = vmatpush3.xpose.msk.msra.mxu1 %vm598_vm1, %v1771_v35 }
 0x2d1   : > { %3050 = vmatprep.subr.msk.mxu1 %vm598_vm1, %v1769_v36 }
 0x2d2   : > { %v1674_v37 = vpop.permute.xlu0 %1673  ;;  %v1676_v38 = vpop.permute.xlu1 %1675 }
 0x2d3   : > { %3045 = vmatprep.mubr.msk.f32.mxu0 %vm598_vm1, %v1674_v37 }
 0x2d4   : > { %3046 = vmatmul.mubr.msk.f32.vlgmr.msra.gmra.mxu0 %vm598_vm1, %v1676_v38  ;;  %3051 = vmatpush3.xpose.msk.msra.mxu1 %vm598_vm1, %v1769_v36 }
 0x2d5   : > { %2395 = vmatprep.mubr.f32.mxu0 %v3452_v0 }
 0x2d6   : > { %v1765_v39 = vpop.permute.xlu0 %1764  ;;  %v1767_v40 = vpop.permute.xlu1 %1766 }
 0x2d7   : > { %3052 = vmatprep.mubr.msk.f32.mxu1 %vm598_vm1, %v1765_v39 }
 0x2d8   : > { %3053 = vmatmul.mubr.msk.f32.vlgmr.msra.gmra.mxu1 %vm598_vm1, %v1767_v40 }
 0x2d9   : > { %2532 = vmatprep.mubr.f32.mxu1 %v3452_v0 }
 0x306   : > { %v3890_v41 = vpop.f32.mrf.mxu0 }
 0x307   : > { %v2067_v43 = vrot.slane %v3890_v41, 1  ;;  %v2088_v44 = vrot.slane %v3890_v41, 2  ;;  %v2109_v45 = vrot.slane %v3890_v41, 3  ;;  %v2130_v46 = vrot.slane %v3890_v41, 4 }
 0x308   : > { %v3892_v42 = vpop.f32.mrf.mxu0  ;;  %v2151_v47 = vrot.slane %v3890_v41, 5  ;;  %v2172_v48 = vrot.slane %v3890_v41, 6  ;;  %v2193_v53 = vrot.slane %v3890_v41, 7 }
 0x309   : > { %v1891_v50 = vrot.slane %v3892_v42, 1  ;;  %v1912_v51 = vrot.slane %v3892_v42, 2  ;;  %v1933_v52 = vrot.slane %v3892_v42, 3  ;;  %v1954_v56 = vrot.slane %v3892_v42, 4 }
 0x30a   : > { %v1975_v58 = vrot.slane %v3892_v42, 5  ;;  %v1996_v59 = vrot.slane %v3892_v42, 6  ;;  %v2017_v1 = vrot.slane %v3892_v42, 7 }
 0x37f   : > { %v3900_v49 = vpop.f32.mrf.mxu1 }
 0x380   : > { %v2090_v54 = vrot.slane %v3900_v49, 1  ;;  %v2039_v60 = vrot.slane %v3900_v49, 7  ;;  %v2111_v62 = vrot.slane %v3900_v49, 2  ;;  %v2132_v63 = vrot.slane %v3900_v49, 3 }
 0x381   : > { %v3911_v61 = vpop.f32.mrf.mxu1  ;;  %v2081_v2 = vsel %vm1876_vm2, %v2067_v43, %v3900_v49  ;;  %v2153_v4 = vrot.slane %v3900_v49, 4  ;;  %v2174_v5 = vrot.slane %v3900_v49, 5  ;;  %v2195_v10 = vrot.slane %v3900_v49, 6 }
 0x382   : > { %v1914_v3 = vrot.slane %v3911_v61, 1  ;;  %v2102_v7 = vsel %vm1876_vm2, %v2088_v44, %v2090_v54  ;;  %v1935_v8 = vrot.slane %v3911_v61, 2  ;;  %v1956_v9 = vrot.slane %v3911_v61, 3 }
 0x383   : > { %v3921_v6 = vpop.f32.mrf.mxu0  ;;  %v1856_v11 = vrot.slane %v3911_v61, 7  ;;  %v1905_v13 = vsel %vm1876_vm2, %v1891_v50, %v3911_v61  ;;  %v2123_v17 = vsel %vm1876_vm2, %v2109_v45, %v2111_v62  ;;  %v2144_v19 = vsel %vm1876_vm2, %v2130_v46, %v2132_v63 }
 0x384   : > { %v2069_v12 = vrot.slane %v3921_v6, 7  ;;  %v2113_v14 = vrot.slane %v3921_v6, 1  ;;  %v1926_v16 = vsel %vm1876_vm2, %v1912_v51, %v1914_v3  ;;  %v2134_v18 = vrot.slane %v3921_v6, 2 }
 0x385   : > { %v3932_v15 = vpop.f32.mrf.mxu0  ;;  %v2103_v21 = vsel %vm1878_vm3, %v2102_v7, %v3921_v6  ;;  %v1947_v22 = vsel %vm1876_vm2, %v1933_v52, %v1935_v8  ;;  %v1968_v23 = vsel %vm1876_vm2, %v1954_v56, %v1956_v9  ;;  %v2155_v28 = vrot.slane %v3921_v6, 3 }
 0x386   : > { %v1893_v20 = vrot.slane %v3932_v15, 7  ;;  %v2124_v25 = vsel %vm1878_vm3, %v2123_v17, %v2113_v14  ;;  %v1937_v26 = vrot.slane %v3932_v15, 1  ;;  %v1958_v27 = vrot.slane %v3932_v15, 2 }
 0x387   : > { %v3943_v24 = vpop.f32.mrf.mxu1  ;;  %v2082_v30 = vsel %vm1878_vm3, %v2081_v2, %v2069_v12  ;;  %v1927_v32 = vsel %vm1878_vm3, %v1926_v16, %v3932_v15  ;;  %v2145_v36 = vsel %vm1878_vm3, %v2144_v19, %v2134_v18  ;;  %v2165_v37 = vsel %vm1876_vm2, %v2151_v47, %v2153_v4 }
 0x388   : > { %v2071_v29 = vrot.slane %v3943_v24, 6  ;;  %v2092_v31 = vrot.slane %v3943_v24, 7  ;;  %v1906_v34 = vsel %vm1878_vm3, %v1905_v13, %v1893_v20  ;;  %v2136_v35 = vrot.slane %v3943_v24, 1 }
 0x389   : > { %v3954_v33 = vpop.f32.mrf.mxu1  ;;  %v2125_v40 = vsel %vm1880_vm4, %v2124_v25, %v3943_v24  ;;  %v1948_v43 = vsel %vm1878_vm3, %v1947_v22, %v1937_v26  ;;  %v1969_v50 = vsel %vm1878_vm3, %v1968_v23, %v1958_v27  ;;  %v2157_v47 = vrot.slane %v3943_v24, 2 }
 0x38a   : > { %v1895_v38 = vrot.slane %v3954_v33, 6  ;;  %v1916_v39 = vrot.slane %v3954_v33, 7  ;;  %v2083_v45 = vsel %vm1880_vm4, %v2082_v30, %v2071_v29  ;;  %v1960_v46 = vrot.slane %v3954_v33, 1 }
 0x38b   : > { %v3965_v44 = vpop.f32.mrf.mxu0  ;;  %v2104_v54 = vsel %vm1880_vm4, %v2103_v21, %v2092_v31  ;;  %v2146_v56 = vsel %vm1880_vm4, %v2145_v36, %v2136_v35  ;;  %v1949_v3 = vsel %vm1880_vm4, %v1948_v43, %v3954_v33  ;;  %v2166_v4 = vsel %vm1878_vm3, %v2165_v37, %v2155_v28 }
 0x38c   : > { %v2073_v51 = vrot.slane %v3965_v44, 5  ;;  %v2094_v52 = vrot.slane %v3965_v44, 6  ;;  %v1907_v63 = vsel %vm1880_vm4, %v1906_v34, %v1895_v38  ;;  %v2115_v2 = vrot.slane %v3965_v44, 7 }
 0x38d   : > { %v3975_v62 = vpop.f32.mrf.mxu0  ;;  %v1928_v9 = vsel %vm1880_vm4, %v1927_v32, %v1916_v39  ;;  %v1970_v12 = vsel %vm1880_vm4, %v1969_v50, %v1960_v46  ;;  %v2147_v17 = vsel %vm1882_vm5, %v2146_v56, %v3965_v44  ;;  %v2159_v18 = vrot.slane %v3965_v44, 1 }
 0x38e   : > { %v1897_v7 = vrot.slane %v3975_v62, 5  ;;  %v1918_v8 = vrot.slane %v3975_v62, 6  ;;  %v2084_v14 = vsel %vm1882_vm5, %v2083_v45, %v2073_v51  ;;  %v1939_v16 = vrot.slane %v3975_v62, 7 }
 0x38f   : > { %v3986_v13 = vpop.f32.mrf.mxu1  ;;  %v2105_v21 = vsel %vm1882_vm5, %v2104_v54, %v2094_v52  ;;  %v2126_v22 = vsel %vm1882_vm5, %v2125_v40, %v2115_v2  ;;  %v1971_v27 = vsel %vm1882_vm5, %v1970_v12, %v3975_v62  ;;  %v2167_v28 = vsel %vm1880_vm4, %v2166_v4, %v2157_v47 }
 0x390   : > { %v2075_v19 = vrot.slane %v3986_v13, 4  ;;  %v2096_v20 = vrot.slane %v3986_v13, 5  ;;  %v2117_v25 = vrot.slane %v3986_v13, 6  ;;  %v2138_v26 = vrot.slane %v3986_v13, 7 }
 0x391   : > { %v3997_v23 = vpop.f32.mrf.mxu1  ;;  %v1908_v30 = vsel %vm1882_vm5, %v1907_v63, %v1897_v7  ;;  %v1929_v32 = vsel %vm1882_vm5, %v1928_v9, %v1918_v8  ;;  %v1950_v35 = vsel %vm1882_vm5, %v1949_v3, %v1939_v16  ;;  %v2168_v37 = vsel %vm1882_vm5, %v2167_v28, %v2159_v18 }
 0x392   : > { %v1899_v29 = vrot.slane %v3997_v23, 4  ;;  %v1920_v31 = vrot.slane %v3997_v23, 5  ;;  %v1941_v34 = vrot.slane %v3997_v23, 6  ;;  %v1962_v36 = vrot.slane %v3997_v23, 7 }
 0x393   : > { %v2085_v39 = vsel %vm1884_vm6, %v2084_v14, %v2075_v19  ;;  %v2106_v40 = vsel %vm1884_vm6, %v2105_v21, %v2096_v20  ;;  %v2127_v43 = vsel %vm1884_vm6, %v2126_v22, %v2117_v25  ;;  %v2148_v45 = vsel %vm1884_vm6, %v2147_v17, %v2138_v26 }
 0x394   : > { %v4012_v38 = vpop.f32.mrf.mxu0  ;;  %v1909_v50 = vsel %vm1884_vm6, %v1908_v30, %v1899_v29  ;;  %v1930_v51 = vsel %vm1884_vm6, %v1929_v32, %v1920_v31  ;;  %v2169_v63 = vsel %vm1884_vm6, %v2168_v37, %v3986_v13  ;;  %v1977_v2 = vrot.slane %v3911_v61, 4 }
 0x395   : > { %v2077_v46 = vrot.slane %v4012_v38, 3  ;;  %v2098_v47 = vrot.slane %v4012_v38, 4  ;;  %v2119_v54 = vrot.slane %v4012_v38, 5  ;;  %v2140_v56 = vrot.slane %v4012_v38, 6 }
 0x396   : > { %v4022_v52 = vpop.f32.mrf.mxu0  ;;  %v1951_v4 = vsel %vm1884_vm6, %v1950_v35, %v1941_v34  ;;  %v1972_v7 = vsel %vm1884_vm6, %v1971_v27, %v1962_v36  ;;  %v2161_v8 = vrot.slane %v4012_v38, 7  ;;  %v1979_v17 = vrot.slane %v3932_v15, 3 }
 0x397   : > { %v1901_v3 = vrot.slane %v4022_v52, 3  ;;  %v2086_v12 = vsel %vm1886_vm7, %v2085_v39, %v2077_v46  ;;  %v1922_v14 = vrot.slane %v4022_v52, 4  ;;  %v1943_v16 = vrot.slane %v4022_v52, 5 }
 0x398   : > { %v4033_v9 = vpop.f32.mrf.mxu1  ;;  %v2107_v20 = vsel %vm1886_vm7, %v2106_v40, %v2098_v47  ;;  %v1964_v21 = vrot.slane %v4022_v52, 6  ;;  %v2128_v26 = vsel %vm1886_vm7, %v2127_v43, %v2119_v54  ;;  %v2149_v28 = vsel %vm1886_vm7, %v2148_v45, %v2140_v56 }
 0x399   : > { %v2079_v18 = vrot.slane %v4033_v9, 2  ;;  %v2100_v19 = vrot.slane %v4033_v9, 3  ;;  %v2121_v25 = vrot.slane %v4033_v9, 4  ;;  %v2142_v27 = vrot.slane %v4033_v9, 5 }
 0x39a   : > { %v4043_v22 = vpop.f32.mrf.mxu1  ;;  %v1910_v31 = vsel %vm1886_vm7, %v1909_v50, %v1901_v3  ;;  %v1931_v34 = vsel %vm1886_vm7, %v1930_v51, %v1922_v14  ;;  %v1952_v36 = vsel %vm1886_vm7, %v1951_v4, %v1943_v16  ;;  %v1973_v45 = vsel %vm1886_vm7, %v1972_v7, %v1964_v21 }
 0x39b   : > { %v2087_v29 = vsel %vm1888_vm8, %v2086_v12, %v2079_v18  ;;  %v1903_v30 = vrot.slane %v4043_v22, 2  ;;  %v1924_v32 = vrot.slane %v4043_v22, 3  ;;  %v1945_v35 = vrot.slane %v4043_v22, 4 }
 0x39c   : > { %2243 = vrot.lane.b32.xlu0 %v2087_v29, %s3457_s30  ;;  %v1966_v37 = vrot.slane %v4043_v22, 5  ;;  %v2108_v40 = vsel %vm1888_vm8, %v2107_v20, %v2100_v19  ;;  %v2129_v43 = vsel %vm1888_vm8, %v2128_v26, %v2121_v25  ;;  %v2150_v50 = vsel %vm1888_vm8, %v2149_v28, %v2142_v27 }
 0x39d   : > { %v1911_v39 = vsel %vm1888_vm8, %v1910_v31, %v1903_v30  ;;  %v1932_v46 = vsel %vm1888_vm8, %v1931_v34, %v1924_v32  ;;  %v1981_v47 = vrot.slane %v3954_v33, 2  ;;  %v1983_v51 = vrot.slane %v3975_v62, 1 }
 0x39e   : > { %2215 = vrot.lane.b32.xlu1 %v1911_v39, %s3457_s30  ;;  %v1953_v54 = vsel %vm1888_vm8, %v1952_v36, %v1945_v35  ;;  %v2163_v56 = vrot.slane %v4033_v9, 6  ;;  %v2170_v3 = vsel %vm1886_vm7, %v2169_v63, %v2161_v8  ;;  %v1989_v4 = vsel %vm1876_vm2, %v1975_v58, %v1977_v2  ;;  %s2900_s30 = sshll.u32 %s3563_s20, 5  ;;  %s3367_s20 = sshll.u32 %s3463_s5, 4  ;;  %s3368_s20 = int_to_ptr.vmem [resolvable:$false] %s3367_s20 }
 0x39f   : > { %v1974_v7 = vsel %vm1888_vm8, %v1973_v45, %v1966_v37  ;;  %v1990_v12 = vsel %vm1878_vm3, %v1989_v4, %v1979_v17  ;;  %v2176_v14 = vrot.slane %v3921_v6, 4  ;;  %v2178_v16 = vrot.slane %v3943_v24, 3  ;;  %s2678_s27 = scalar_lea.hbm %s4291_s14, %s2900_s30  ;;  %s3369_s7 = scalar_lea.vmem %s3368_s20, 64 }
 0x3a0   : > { %2247 = vrot.lane.b32.xlu0 %v2108_v40, %s3456_s29  ;;  %v1985_v18 = vrot.slane %v4022_v52, 7  ;;  %v1987_v19 = vrot.slane %v4043_v22, 6  ;;  %v1991_v63 = vsel %vm1880_vm4, %v1990_v12, %v1981_v47  ;;  %v2180_v8 = vrot.slane %v3965_v44, 2 }
 0x3a1   : > { %v1992_v58 = vsel %vm1882_vm5, %v1991_v63, %v1983_v51  ;;  %v2182_v2 = vrot.slane %v3986_v13, 1  ;;  %v2186_v17 = vsel %vm1876_vm2, %v2172_v48, %v2174_v5  ;;  %v1998_v20 = vrot.slane %v3911_v61, 5 }
 0x3a2   : > { %2219 = vrot.lane.b32.xlu1 %v1932_v46, %s3456_s29  ;;  %v2171_v21 = vsel %vm1888_vm8, %v2170_v3, %v2163_v56  ;;  %v2184_v25 = vrot.slane %v4033_v9, 7  ;;  %v2187_v26 = vsel %vm1878_vm3, %v2186_v17, %v2176_v14  ;;  %v2000_v27 = vrot.slane %v3932_v15, 4  ;;  %s2839_s29 = sshll.u32 %s3735_s17, 1 }
 0x3a3   : > { %v1993_v28 = vsel %vm1884_vm6, %v1992_v58, %v3997_v23  ;;  %v2188_v29 = vsel %vm1880_vm4, %v2187_v26, %v2178_v16  ;;  %v2002_v30 = vrot.slane %v3954_v33, 3  ;;  %v2004_v48 = vrot.slane %v3975_v62, 2 }
 0x3a4   : > { %2251 = vrot.lane.b32.xlu0 %v2129_v43, %s3458_s24  ;;  %v1994_v5 = vsel %vm1886_vm7, %v1993_v28, %v1985_v18  ;;  %v2189_v31 = vsel %vm1882_vm5, %v2188_v29, %v2180_v8  ;;  %v2006_v32 = vrot.slane %v3997_v23, 1  ;;  %v2008_v34 = vrot.slane %v4043_v22, 7 }
 0x3a5   : > { %v1995_v35 = vsel %vm1888_vm8, %v1994_v5, %v1987_v19  ;;  %v2190_v36 = vsel %vm1884_vm6, %v2189_v31, %v2182_v2  ;;  %v2010_v37 = vsel %vm1876_vm2, %v1996_v59, %v1998_v20  ;;  %v2197_v39 = vrot.slane %v3921_v6, 5 }
 0x3a6   : > { %2223 = vrot.lane.b32.xlu1 %v1953_v54, %s3458_s24  ;;  %v2191_v40 = vsel %vm1886_vm7, %v2190_v36, %v4012_v38  ;;  %v2011_v43 = vsel %vm1878_vm3, %v2010_v37, %v2000_v27  ;;  %v2199_v45 = vrot.slane %v3943_v24, 4  ;;  %v2201_v46 = vrot.slane %v3965_v44, 3  ;;  %v2297_v37 = vld [vmem:[%s4286_s9 + $0x18] sm:$0xff]  ;;  %s588_s24 = scalar_lea.vmem [#allocation15], %s2839_s29 }
 0x3a7   : > { %v2192_v47 = vsel %vm1888_vm8, %v2191_v40, %v2184_v25  ;;  %v2012_v51 = vsel %vm1880_vm4, %v2011_v43, %v2002_v30  ;;  %v2203_v54 = vrot.slane %v3986_v13, 2  ;;  %v2019_v59 = vrot.slane %v3911_v61, 6  ;;  %v2295_v43 = vld [vmem:[%s4286_s9 + $0x8] sm:$0xff] }
 0x3a8   : > { %2255 = vrot.lane.b32.xlu0 %v2150_v50, %s3454_s28  ;;  %v2013_v56 = vsel %vm1882_vm5, %v2012_v51, %v2004_v48  ;;  %v2205_v3 = vrot.slane %v4012_v38, 1  ;;  %v2207_v4 = vsel %vm1876_vm2, %v2193_v53, %v2195_v10  ;;  %v2021_v50 = vrot.slane %v3932_v15, 5  ;;  %v2433_v51 = vld [vmem:[%s4288_s11 + $0x8] sm:$0xff] }
 0x3a9   : > { %v2014_v12 = vsel %vm1884_vm6, %v2013_v56, %v2006_v32  ;;  %v2208_v14 = vsel %vm1878_vm3, %v2207_v4, %v2197_v39  ;;  %v2023_v16 = vrot.slane %v3954_v33, 4  ;;  %v2025_v18 = vrot.slane %v3975_v62, 3  ;;  %v2296_v39 = vld [vmem:[%s4286_s9 + $0x10] sm:$0xff] }
 0x3aa   : > { %2227 = vrot.lane.b32.xlu1 %v1974_v7, %s3454_s28  ;;  %v2015_v19 = vsel %vm1886_vm7, %v2014_v12, %v4022_v52  ;;  %v2209_v63 = vsel %vm1880_vm4, %v2208_v14, %v2199_v45  ;;  %v2027_v8 = vrot.slane %v3997_v23, 2  ;;  %v2042_v53 = vrot.slane %v3921_v6, 6  ;;  %v2434_v45 = vld [vmem:[%s4288_s11 + $0x10] sm:$0xff] }
 0x3ab   : > { %v2210_v10 = vsel %vm1882_vm5, %v2209_v63, %v2201_v46  ;;  %v2029_v7 = vrot.slane %v4022_v52, 1  ;;  %v2031_v58 = vsel %vm1876_vm2, %v2017_v1, %v2019_v59  ;;  %v2045_v2 = vrot.slane %v3943_v24, 5  ;;  %v2435_v46 = vld [vmem:[%s4288_s11 + $0x18] sm:$0xff] }
 0x3ac   : > { %2259 = vrot.lane.b32.xlu0 %v2171_v21, %s3459_s25  ;;  %v2016_v17 = vsel %vm1888_vm8, %v2015_v19, %v2008_v34  ;;  %v2211_v20 = vsel %vm1884_vm6, %v2210_v10, %v2203_v54  ;;  %v2032_v25 = vsel %vm1878_vm3, %v2031_v58, %v2021_v50  ;;  %v2048_v6 = vrot.slane %v3965_v44, 4 }
 0x3ad   : > { %v2212_v21 = vsel %vm1886_vm7, %v2211_v20, %v2205_v3  ;;  %v2033_v26 = vsel %vm1880_vm4, %v2032_v25, %v2023_v16  ;;  %v2051_v27 = vrot.slane %v3986_v13, 3  ;;  %v2059_v1 = vsel %vm1876_vm2, %v3890_v41, %v2039_v60 }
 0x3ae   : > { %2231 = vrot.lane.b32.xlu1 %v1995_v35, %s3459_s25  ;;  %v2054_v24 = vrot.slane %v4012_v38, 2  ;;  %v2060_v28 = vsel %vm1878_vm3, %v2059_v1, %v2042_v53  ;;  %v1859_v29 = vrot.slane %v3932_v15, 6  ;;  %v1862_v44 = vrot.slane %v3954_v33, 5  ;;  %s2680_s25 = sshll.u32 %s588_s24, 4  ;;  %s2681_s25 = int_to_ptr.vmem [resolvable:$true] %s2680_s25 }
 0x3af   : > { %v2034_v30 = vsel %vm1882_vm5, %v2033_v26, %v2025_v18  ;;  %v2061_v48 = vsel %vm1880_vm4, %v2060_v28, %v2045_v2  ;;  %v2057_v13 = vrot.slane %v4033_v9, 1  ;;  %v1865_v49 = vrot.slane %v3975_v62, 4  ;;  %v2290_v28 = vld [vmem:[%s4285_s8] sm:$0xff]  ;;  %s3363_s2 = scalar_lea.vmem %s2681_s25, 32  ;;  %p3370_p5 = scmp.lt.s32.totalorder %s2681_s25, %s3368_s20 }
 0x3b0   : > { %2263 = vrot.lane.b32.xlu0 %v2192_v47, %s3455_s4  ;;  %v2035_v41 = vsel %vm1884_vm6, %v2034_v30, %v2027_v8  ;;  %v2062_v60 = vsel %vm1882_vm5, %v2061_v48, %v2048_v6  ;;  %v1868_v38 = vrot.slane %v3997_v23, 3  ;;  %v1877_v15 = vsel %vm1876_vm2, %v3892_v42, %v1856_v11  ;;  %v2432_v47 = vld [vmem:[%s4288_s11] sm:$0xff]  ;;  %v2292_v30 = vld [vmem:[%s4285_s8 + $0x10] sm:$0xff]  ;;  %v2293_v48 = vld [vmem:[%s4285_s8 + $0x18] sm:$0xff]  ;;  %p3364_p8 = scmp.ne.s32.totalorder %s2681_s25, %s3363_s2  ;;  %p3371_p1 = scmp.lt.s32.totalorder %s3369_s7, %s3363_s2 }
 0x3b1   : > { %v2036_v33 = vsel %vm1886_vm7, %v2035_v41, %v2029_v7  ;;  %v2063_v5 = vsel %vm1884_vm6, %v2062_v60, %v2051_v27  ;;  %v1871_v31 = vrot.slane %v4022_v52, 2  ;;  %v1879_v62 = vsel %vm1878_vm3, %v1877_v15, %v1859_v29 }
 0x3b2   : > { %2235 = vrot.lane.b32.xlu1 %v2016_v17, %s3455_s4  ;;  %v2213_v32 = vsel %vm1888_vm8, %v2212_v21, %v4033_v9  ;;  %v2064_v23 = vsel %vm1886_vm7, %v2063_v5, %v2054_v24  ;;  %v1881_v61 = vsel %vm1880_vm4, %v1879_v62, %v1862_v44  ;;  %v1874_v34 = vrot.slane %v4043_v22, 1  ;;  %v2291_v44 = vld [vmem:[%s4285_s8 + $0x8] sm:$0xff]  ;;  %s2566_s4 = sld [smem:[#allocation2]]  ;;  %p3365_p11 = pnand %p3364_p8, %p4336_p10 }
 0x3b3   : > { %v2065_v42 = vsel %vm1888_vm8, %v2064_v23, %v2057_v13  ;;  %v1883_v11 = vsel %vm1882_vm5, %v1881_v61, %v1865_v49  ;;  %v2037_v52 = vsel %vm1888_vm8, %v2036_v33, %v4043_v22  ;;  %v3461_v40 = vmov 0   ;;  %v2294_v22 = vld [vmem:[%s4286_s9] sm:$0xff]  ;;  %p3372_p3 = por %p3371_p1, %p3370_p5 }
 0x3b4   : > { %2267 = vrot.lane.b32.xlu0 %v2213_v32, %s3460_s13  ;;  %v1885_v35 = vsel %vm1884_vm6, %v1883_v11, %v1868_v38  ;;  %3178 = vset.pattern.permute.xlu1 %v3461_v40  ;;  %p3366_p13 = pneg %p3365_p11 }
 0x3b5   : > { %v1887_v9 = vsel %vm1886_vm7, %v1885_v35, %v1871_v31  ;;  %3177 = vset.pattern.permute.xlu0 %v3461_v40 }
 0x3b6   : > { %2239 = vrot.lane.b32.xlu1 %v2037_v52, %s3460_s13  ;;  %v1889_v36 = vsel %vm1888_vm8, %v1887_v9, %v1874_v34  ;;  %p3373_p4 = pnand %p3372_p3, %p3366_p13 }
 0x3b8   : > { %2315 = vperm.xlu0 %3177, %v2297_v37  }
 0x3ba   : > { %2310 = vperm.xlu1 %3178, %v2296_v39  }
 0x3bc   : > { %2300 = vperm.xlu0 %3177, %v2294_v22  }
 0x3be   : > { %2305 = vperm.xlu1 %3178, %v2295_v43  }
 0x3c0   : > { %2448 = vperm.xlu0 %3177, %v2434_v45  }
 0x3c2   : > { %2453 = vperm.xlu1 %3178, %v2435_v46  }
 0x3c4   : > { %2438 = vperm.xlu0 %3177, %v2432_v47  }
 0x3c6   : > { %2443 = vperm.xlu1 %3178, %v2433_v51   ;;  %v2428_v51 = vld [vmem:[#allocation14] sm:$0xff] }
 0x40e   : > { %v2244_v54 = vpop.permute.xlu0 %2243 }
 0x40f   : > { %v2283_v19 = vsel %vm2270_vm9, %v2065_v42, %v2244_v54  ;;  %v2429_v54 = vld [vmem:[#allocation14 + $0x8] sm:$0xff] }
 0x410   : > { %v2216_v59 = vpop.permute.xlu1 %2215 }
 0x411   : > { %v2271_v53 = vsel %vm2270_vm9, %v1889_v36, %v2216_v59  ;;  %v2430_v59 = vld [vmem:[#allocation14 + $0x10] sm:$0xff] }
 0x412   : > { %v2248_v56 = vpop.permute.xlu0 %2247 }
 0x413   : > { %v2284_v63 = vsel %vm598_vm1, %v2283_v19, %v2248_v56  ;;  %v2431_v56 = vld [vmem:[#allocation14 + $0x18] sm:$0xff] }
 0x414   : > { %v2220_v3 = vpop.permute.xlu1 %2219 }
 0x415   : > { %v2272_v7 = vsel %vm598_vm1, %v2271_v53, %v2220_v3 }
 0x416   : > { %v2252_v4 = vpop.permute.xlu0 %2251 }
 0x417   : > { %v2285_v10 = vsel %vm2273_vm10, %v2284_v63, %v2252_v4 }
 0x418   : > { %v2224_v50 = vpop.permute.xlu1 %2223 }
 0x419   : > { %v2274_v17 = vsel %vm2273_vm10, %v2272_v7, %v2224_v50 }
 0x41a   : > { %v2256_v12 = vpop.permute.xlu0 %2255 }
 0x41b   : > { %v2286_v58 = vsel %vm2275_vm11, %v2285_v10, %v2256_v12 }
 0x41c   : > { %v2228_v14 = vpop.permute.xlu1 %2227 }
 0x41d   : > { %v2276_v25 = vsel %vm2275_vm11, %v2274_v17, %v2228_v14 }
 0x41e   : > { %v2260_v16 = vpop.permute.xlu0 %2259 }
 0x41f   : > { %v2287_v20 = vsel %vm2277_vm12, %v2286_v58, %v2260_v16 }
 0x420   : > { %v2232_v18 = vpop.permute.xlu1 %2231 }
 0x421   : > { %v2278_v26 = vsel %vm2277_vm12, %v2276_v25, %v2232_v18 }
 0x422   : > { %v2264_v8 = vpop.permute.xlu0 %2263 }
 0x423   : > { %v2288_v6 = vsel %vm2279_vm13, %v2287_v20, %v2264_v8 }
 0x424   : > { %v2236_v2 = vpop.permute.xlu1 %2235 }
 0x425   : > { %v2280_v1 = vsel %vm2279_vm13, %v2278_v26, %v2236_v2 }
 0x426   : > { %v2268_v21 = vpop.permute.xlu0 %2267 }
 0x427   : > { %v2289_v27 = vsel %vm2281_vm14, %v2288_v6, %v2268_v21 }
 0x428   : > { %2361 = vmatprep.subr.mxu0 %v2289_v27  ;;  %v2240_v24 = vpop.permute.xlu1 %2239 }
 0x429   : > { %v2282_v29 = vsel %vm2281_vm14, %v2280_v1, %v2240_v24 }
 0x42a   : > { %2362 = vmatpush1.msra.mxu0 %v2282_v29 }
 0x42b   : > { %2884 = vmatmul.mubr.msk.f32.vlgmr.msra.gmra.mxu0 %vm2318_vm15, %v2290_v28 }
 0x42c   : > { %2401 = vmatprep.mubr.f32.mxu0 %v3452_v0 }
 0x42f   : > { %2885 = vmatmul.mubr.msk.f32.gmra.mxu0 %vm2318_vm15, %v2291_v44 }
 0x430   : > { %2407 = vmatprep.mubr.f32.mxu0 %v3452_v0 }
 0x433   : > { %2886 = vmatmul.mubr.msk.f32.gmra.mxu0 %vm2318_vm15, %v2292_v30  ;;  %v2316_v5 = vpop.permute.xlu0 %2315  ;;  %v2565_v30 = vld [vmem:[%s4289_s12] sm:$0x1] }
 0x434   : > { %2413 = vmatprep.mubr.f32.mxu0 %v3452_v0 }
 0x435   : > { %v2311_v15 = vpop.permute.xlu1 %2310 }
 0x437   : > { %2887 = vmatmul.mubr.msk.f32.gmra.mxu0 %vm2318_vm15, %v2293_v48  ;;  %v2301_v11 = vpop.permute.xlu0 %2300  ;;  %v3462_v48 = vmov 1966171168  }
 0x438   : > { %2635 = vmatprep.mubr.f32.mxu0 %v3452_v0 }
 0x439   : > { %v2306_v23 = vpop.permute.xlu1 %2305 }
 0x43b   : > { %v2449_v19 = vpop.permute.xlu0 %2448 }
 0x43d   : > { %v2454_v16 = vpop.permute.xlu1 %2453 }
 0x43f   : > { %v2439_v20 = vpop.permute.xlu0 %2438 }
 0x441   : > { %v2444_v58 = vpop.permute.xlu1 %2443 }
 0x4eb   : > { %v2397_v13 = vpop.f32.mrf.mxu0 }
 0x4ec   : > { %v2398_v40 = vadd.f32 %v2397_v13, %v2301_v11  ;;  %v2646_v13 = vunpack.c.l.s4 %v3462_v48 }
 0x4ed   : > { %v2399_v49 = vpop.f32.mrf.mxu0 }
 0x4ee   : > { %v2400_v37 = vadd.f32 %v2399_v49, %v2301_v11  ;;  %v2420_v47 = vmax.f32 %v2398_v40, 0.0  ;;  %v2647_v49 = vunpack.c.0.s8 %v2646_v13 }
 0x4ef   : > { %v2403_v41 = vpop.f32.mrf.mxu0 }
 0x4f0   : > { %v2404_v9 = vadd.f32 %v2403_v41, %v2306_v23  ;;  %v2421_v46 = vmax.f32 %v2400_v37, 0.0  ;;  %v2567_v41 = vstv %s2566_s4 }
 0x4f1   : > { %v2405_v60 = vpop.f32.mrf.mxu0 }
 0x4f2   : > { %v2406_v52 = vadd.f32 %v2405_v60, %v2306_v23  ;;  %v2422_v45 = vmax.f32 %v2404_v9, 0.0 }
 0x4f3   : > { %v2409_v38 = vpop.f32.mrf.mxu0 }
 0x4f4   : > { %v2410_v42 = vadd.f32 %v2409_v38, %v2311_v15  ;;  %v2423_v43 = vmax.f32 %v2406_v52, 0.0 }
 0x4f5   : > { %v2411_v33 = vpop.f32.mrf.mxu0 }
 0x4f6   : > { %v2412_v61 = vadd.f32 %v2411_v33, %v2311_v15  ;;  %v2424_v22 = vmax.f32 %v2410_v42, 0.0 }
 0x4f7   : > { %v2415_v31 = vpop.f32.mrf.mxu0 }
 0x4f8   : > { %v2416_v62 = vadd.f32 %v2415_v31, %v2316_v5  ;;  %v2425_v39 = vmax.f32 %v2412_v61, 0.0 }
 0x4f9   : > { %v2417_v32 = vpop.f32.mrf.mxu0 }
 0x4fa   : > { %v2418_v34 = vadd.f32 %v2417_v32, %v2316_v5  ;;  %v2426_v36 = vmax.f32 %v2416_v62, 0.0  ;;  %v2650_v5 = vsub.s32 %v2647_v49, %v3807_v57 }
 0x4fc   : > { %v2427_v35 = vmax.f32 %v2418_v34, 0.0 }
 0x4fe   : > { %2492 = vmatprep.subr.mxu1 %v2427_v35 }
 0x4ff   : > { %2493 = vmatpush1.msra.mxu1 %v2426_v36 }
 0x500   : > { %2494 = vmatprep.subr.mxu1 %v2425_v39 }
 0x501   : > { %2495 = vmatpush1.msra.mxu1 %v2424_v22 }
 0x502   : > { %2496 = vmatprep.subr.mxu1 %v2423_v43 }
 0x503   : > { %2497 = vmatpush1.msra.mxu1 %v2422_v45 }
 0x504   : > { %2498 = vmatprep.subr.mxu1 %v2421_v46 }
 0x505   : > { %2499 = vmatpush1.msra.mxu1 %v2420_v47 }
 0x506   : > { %2888 = vmatmul.mubr.msk.f32.vlgmr.msra.gmra.mxu1 %vm598_vm1, %v2428_v51 }
 0x507   : > { %2538 = vmatprep.mubr.f32.mxu1 %v3452_v0 }
 0x50a   : > { %2889 = vmatmul.mubr.msk.f32.gmra.mxu1 %vm598_vm1, %v2429_v54 }
 0x50b   : > { %2544 = vmatprep.mubr.f32.mxu1 %v3452_v0 }
 0x50e   : > { %2890 = vmatmul.mubr.msk.f32.gmra.mxu1 %vm598_vm1, %v2430_v59 }
 0x50f   : > { %2550 = vmatprep.mubr.f32.mxu1 %v3452_v0 }
 0x512   : > { %2891 = vmatmul.mubr.msk.f32.gmra.mxu1 %vm598_vm1, %v2431_v56 }
 0x5c6   : > { %v2534_v3 = vpop.f32.mrf.mxu1 }
 0x5c7   : > { %v2535_v27 = vadd.f32 %v2534_v3, %v2439_v20 }
 0x5c8   : > { %v2536_v4 = vpop.f32.mrf.mxu1 }
 0x5c9   : > { %v2537_v21 = vadd.f32 %v2536_v4, %v2439_v20  ;;  %v2557_v44 = vmax.f32 %v2535_v27, 0.0 }
 0x5ca   : > { %v2540_v50 = vpop.f32.mrf.mxu1 }
 0x5cb   : > { %v2541_v25 = vadd.f32 %v2540_v50, %v2444_v58  ;;  %v2558_v29 = vmax.f32 %v2537_v21, 0.0 }
 0x5cc   : > { %v2542_v12 = vpop.f32.mrf.mxu1 }
 0x5cd   : > { %v2543_v17 = vadd.f32 %v2542_v12, %v2444_v58  ;;  %v2559_v28 = vmax.f32 %v2541_v25, 0.0 }
 0x5ce   : > { %v2546_v14 = vpop.f32.mrf.mxu1 }
 0x5cf   : > { %v2547_v2 = vadd.f32 %v2546_v14, %v2449_v19  ;;  %v2560_v24 = vmax.f32 %v2543_v17, 0.0 }
 0x5d0   : > { %v2548_v18 = vpop.f32.mrf.mxu1 }
 0x5d1   : > { %v2549_v10 = vadd.f32 %v2548_v18, %v2449_v19  ;;  %v2561_v1 = vmax.f32 %v2547_v2, 0.0 }
 0x5d2   : > { %v2552_v63 = vpop.f32.mrf.mxu1 }
 0x5d3   : > { %v2553_v8 = vadd.f32 %v2552_v63, %v2454_v16  ;;  %v2562_v26 = vmax.f32 %v2549_v10, 0.0 }
 0x5d4   : > { %v2554_v53 = vpop.f32.mrf.mxu1 }
 0x5d5   : > { %v2555_v7 = vadd.f32 %v2554_v53, %v2454_v16  ;;  %v2563_v6 = vmax.f32 %v2553_v8, 0.0 }
 0x5d7   : > { %v2564_v0 = vmax.f32 %v2555_v7, 0.0 }
 0x5d9   : > { %2595 = vmatprep.subr.mxu0 %v2564_v0 }
 0x5da   : > { %2596 = vmatpush1.msra.mxu0 %v2563_v6 }
 0x5db   : > { %2597 = vmatprep.subr.mxu0 %v2562_v26 }
 0x5dc   : > { %2598 = vmatpush1.msra.mxu0 %v2561_v1 }
 0x5dd   : > { %2599 = vmatprep.subr.mxu0 %v2560_v24 }
 0x5de   : > { %2600 = vmatpush1.msra.mxu0 %v2559_v28 }
 0x5df   : > { %2601 = vmatprep.subr.mxu0 %v2558_v29 }
 0x5e0   : > { %2602 = vmatpush1.msra.mxu0 %v2557_v44 }
 0x5e1   : > { %2892 = vmatmul.mubr.msk.f32.vlgmr.msra.gmra.mxu0 %vm598_vm1, %v2565_v30 }
 0x6a1   : > { %v2637_v60 = vpop.f32.mrf.mxu0 }
 0x6a2   : > { %v2638_v15 = vadd.f32 %v2637_v60, %v2567_v41 }
 0x6a3   : > { %v2639_v38 = vpop.f32.mrf.mxu0 }
 0x6a4   : > { %v2640_v33 = vadd.f32 %v2639_v38, %v2567_v41 }
 0x6a6   : > { %v2644_v31 = vcombine.low %v2638_v15, %v2640_v33 }
 0x6a8   : > { %v2651_v62 = vrot.slane %v2644_v31, %v2650_v5 }
 0x6aa   : > { %v2658_v32 = vrot.slane %v2651_v62, %v2650_v5 }
 0x6ac   : > { %2664 = vst.msk [vmem:[%s588_s24] sm:$0x3] %vm2662_vm0, %v2658_v32 }
 0x6ad   : > { %3376 = shalt.err (!%p3373_p4)
}
 0x6ae   : > { %s3377_s10 = scalar_lea.hbm %s2678_s27, 32  ;;  %s3381_s19 = scalar_lea.hbm %s4291_s14, 64 }
 0x6af   : > { %p3378_p6 = scmp.ne.s32.totalorder %s2678_s27, %s3377_s10  ;;  %p3382_p7 = scmp.lt.s32.totalorder %s2678_s27, %s4291_s14 }
 0x6b0   : > { %p3383_p2 = scmp.lt.s32.totalorder %s3381_s19, %s3377_s10 }
 0x6b1   : > { %p3379_p12 = pnand %p3378_p6, %p4336_p10 }
 0x6b2   : > { %p3384_p9 = por %p3383_p2, %p3382_p7 }
 0x6b3   : > { %p3380_p0 = pneg %p3379_p12 }
 0x6b5   : > { %p3385_p8 = pnand %p3384_p9, %p3380_p0 }
 0x6b7   : > { %3388 = shalt.err (!%p3385_p8)
}
 0x6b8   : > { %3081 = dma.vmem_to_hbm [thread:$0]  (%p4336_p10), %s2681_s25, 32, %s2678_s27, %s2666_s22  }
 0x6b9 PF: > { %s2692_s29 = sand.u32 1, %s3427_s15   ;;  %p4337_p11 = scmp.ne.s32.totalorder %s4326_s26, 0 }
 0x6ba   : > { %p4338_p13 = scmp.ge.s32.totalorder %s3439_s18, 2  ;;  %s2693_s30 = scalar_lea.sflag [#allocation5], %s2692_s29 }
 0x6bc   : > { %p3107_p5 = pnand %p4338_p13, %p4337_p11 }
 0x6be   : > { %p3108_p1 = pneg %p3107_p5 }
 0x6c0   : > { %3422 = dma.done.wait (%p3108_p1), %s2693_s30, 32  }
 0x6c1   : > { %3424 = vsyncadd (%p3108_p1), %s2693_s30, 4294967264  ;;  %s4339_s18 = sld [smem:[#allocation22_spill]]  ;;  %s4342_s15 = smov %s3431_s16 }
 0x6c2   : > { %s4340_s24 = sld [smem:[#allocation21_spill]] }
 0x6c3   : > { %s4341_s17 = sld [smem:[#allocation23_spill]] }
 0x6c7   : > { %p31_p3 = scmp.ge.s32.totalorder %s4339_s18, 4  }
 0x6c8   : > { %s4343_s16 = smov %s4340_s24 }
 0x6c9   :  { %33 = sbr.rel (!%p31_p3) target bundleno = 16 (0x10), region = 148 }
 0x6ce   :  { %2698 = vsyncpa [#allocation4], 1 }
 0x6cf   :  { %2700 = vsyncpa [#allocation4 + $0x1], 1 }
 0x6d0   :  { %2701 = vsyncpa [#allocation7], 1 }
 0x6d1   :  { %2702 = vsyncpa [#allocation10], 1 }
 0x6d2   :  { %2703 = vsyncpa [#allocation13], 1 }
 0x6d3   :  { %2704 = vsyncpa [#allocation5], 1 }
 0x6d4   :  { %2706 = vsyncpa [#allocation5 + $0x1], 1 }

</bundles_post_ra>
